<compile_context>
chip_gen: v7x
topology: tpu7x:2x2x1
jax: 0.10.0
libtpu: 0.0.40
codegen_flags: <defaults>
</compile_context>

<pallas_src>
import functools

import jax
import jax.numpy as jnp
from jax import lax
from jax.experimental import pallas as pl
from jax.experimental.pallas import tpu as pltpu


# safe on v5e/v6e (128 MiB physical VMEM) and under v7x's 64 MiB with headroom
_VMEM_LIMIT = 48 * 1024 * 1024


def _round_up(x, m):
    return ((x + m - 1) // m) * m


def _decoder_tiles(vocab, block_n=1024):
    """Vocab tile width + padded vocab width so the decoder is ALWAYS N-tiled."""
    bn = min(block_n, _round_up(vocab, 128))
    return bn, _round_up(vocab, bn)


def _seq_tile(seq):
    """Sequence-row tile for the fused attention / FFN blocks."""
    if seq % 128 == 0:
        return 128
    if seq % 8 == 0:
        return 8
    return seq


def _spec(block_shape, index_map, *, invariant=False):
    """BlockSpec; grid-invariant operands are single-buffered (no 2x VMEM)."""
    if invariant:
        try:
            return pl.BlockSpec(block_shape, index_map,
                                pipeline_mode=pl.Buffered(1))
        except TypeError:   # older jax without pipeline_mode / Buffered kwargs
            return pl.BlockSpec(block_shape, index_map)
    return pl.BlockSpec(block_shape, index_map)


# ----------------------------- Pallas kernels -----------------------------

def _attn_block_kernel(nheads, eps, xq_ref, xkv_ref, bias_ref,
                       qw_ref, qb_ref, kvw_ref, kvb_ref,
                       aow_ref, aob_ref, g_ref, beta_ref, o_ref, ctx_ref):
    """Fused attention sub-block for one (batch, seq-row-tile) grid step.

    out = LayerNorm(x_tile + MHA(x)_tile).  1/sqrt(Dh) is folded into qw/qb at
    init; weights arrive pre-cast to bf16; mask/softmax/LayerNorm stay in f32.
    """
    xq = xq_ref[0]                                   # [TS, Hs] f32 (query rows)
    xkv = xkv_ref[0]                                 # [S,  Hs] f32 (full sequence)
    TS, Hs = xq.shape
    S = xkv.shape[0]
    Dh = Hs // nheads

    q = jnp.dot(xq.astype(jnp.bfloat16), qw_ref[...],
                preferred_element_type=jnp.float32) + qb_ref[...]       # [TS, Hs]
    kv = jnp.dot(xkv.astype(jnp.bfloat16), kvw_ref[...],
                 preferred_element_type=jnp.float32) + kvb_ref[...]     # [S, 2Hs]

    q_bf = q.astype(jnp.bfloat16)
    k_bf = kv[:, :Hs].astype(jnp.bfloat16)
    v_bf = kv[:, Hs:].astype(jnp.bfloat16)
    # hoisted: one [TS,S] mask broadcast instead of nheads re-broadcasts
    bias_b = jnp.broadcast_to(bias_ref[0], (TS, S))

    for hh in range(nheads):                         # static unroll over heads
        qh = q_bf[:, hh * Dh:(hh + 1) * Dh]
        kh = k_bf[:, hh * Dh:(hh + 1) * Dh]
        vh = v_bf[:, hh * Dh:(hh + 1) * Dh]
        # q @ k^T via contracting dims -> no explicit transpose
        s = lax.dot_general(qh, kh, (((1,), (1,)), ((), ())),
                            preferred_element_type=jnp.float32)         # [TS, S]
        s = s + bias_b
        s = s - jnp.max(s, axis=-1, keepdims=True)
        p = jnp.exp(s)
        p = p * pl.reciprocal(jnp.sum(p, axis=-1, keepdims=True), approx=True)
        # stash per-head context at static column offsets (no f32 acc kept live)
        ctx_ref[:, hh * Dh:(hh + 1) * Dh] = jnp.dot(
            p.astype(jnp.bfloat16), vh, preferred_element_type=jnp.float32)

    # ONE [TS,Hs] x [Hs,Hs] output projection (full-K MXU fill, single matmul)
    attn = jnp.dot(ctx_ref[...].astype(jnp.bfloat16), aow_ref[...],
                   preferred_element_type=jnp.float32) + aob_ref[...]

    y = xq + attn
    mu = jnp.mean(y, axis=-1, keepdims=True)
    var = jnp.mean((y - mu) ** 2, axis=-1, keepdims=True)
    o_ref[0] = ((y - mu) * lax.rsqrt(var + eps) * g_ref[...]
                + beta_ref[...]).astype(o_ref.dtype)


def pallas_attention_block(h, bias, lp, nheads, eps=1e-12):
    """h:[B,S,Hs]; bias:[B,1,S] additive mask -> LayerNorm(h + MHA(h))."""
    B, S, Hs = h.shape
    ts = _seq_tile(S)
    kern = functools.partial(_attn_block_kernel, nheads, eps)
    inv = functools.partial(_spec, invariant=True)
    return pl.pallas_call(
        kern,
        out_shape=jax.ShapeDtypeStruct((B, S, Hs), jnp.float32),
        grid=(B, S // ts),
        in_specs=[
            pl.BlockSpec((1, ts, Hs), lambda b, s: (b, s, 0)),   # query-row tile
            pl.BlockSpec((1, S, Hs), lambda b, s: (b, 0, 0)),    # full seq for K/V
            pl.BlockSpec((1, 1, S), lambda b, s: (b, 0, 0)),     # additive mask
            inv((Hs, Hs), lambda b, s: (0, 0)),                  # q_w  (bf16, scaled)
            inv((1, Hs), lambda b, s: (0, 0)),
            inv((Hs, 2 * Hs), lambda b, s: (0, 0)),              # kv_w (bf16)
            inv((1, 2 * Hs), lambda b, s: (0, 0)),
            inv((Hs, Hs), lambda b, s: (0, 0)),                  # ao_w (bf16)
            inv((1, Hs), lambda b, s: (0, 0)),
            inv((1, Hs), lambda b, s: (0, 0)),                   # ln gamma
            inv((1, Hs), lambda b, s: (0, 0)),                   # ln beta
        ],
        out_specs=pl.BlockSpec((1, ts, Hs), lambda b, s: (b, s, 0)),
        scratch_shapes=[pltpu.VMEM((ts, Hs), jnp.float32)],      # per-head ctx concat
        compiler_params=pltpu.CompilerParams(
            dimension_semantics=("parallel", "parallel"),
            vmem_limit_bytes=_VMEM_LIMIT),
    )(h, h, bias,
      lp["q_w"], lp["q_b"].reshape(1, Hs),
      lp["kv_w"], lp["kv_b"].reshape(1, 2 * Hs),
      lp["ao_w"], lp["ao_b"].reshape(1, Hs),
      lp["attn_ln_g"].reshape(1, Hs), lp["attn_ln_b"].reshape(1, Hs))


def _ffn_block_kernel(eps, x_ref, wi_ref, bi_ref, wo_ref, bo_ref,
                      g_ref, beta_ref, o_ref):
    """Fused FFN sub-block: LayerNorm(x + W2 @ gelu(W1 @ x)) on a row tile."""
    x = x_ref[0]                                     # [TS, Hs] f32
    inter = jnp.dot(x.astype(jnp.bfloat16), wi_ref[...],
                    preferred_element_type=jnp.float32) + bi_ref[...]
    # TODO(synk): exact (erf) BERT GELU replaced by tanh approximation inside
    #             the fused kernel for robust Mosaic lowering (~1e-3 rel diff).
    inter = jax.nn.gelu(inter, approximate=True)
    ffn = jnp.dot(inter.astype(jnp.bfloat16), wo_ref[...],
                  preferred_element_type=jnp.float32) + bo_ref[...]
    y = x + ffn
    mu = jnp.mean(y, axis=-1, keepdims=True)
    var = jnp.mean((y - mu) ** 2, axis=-1, keepdims=True)
    o_ref[0] = ((y - mu) * lax.rsqrt(var + eps) * g_ref[...]
                + beta_ref[...]).astype(o_ref.dtype)


def pallas_ffn_block(h, lp, eps=1e-12):
    B, S, Hs = h.shape
    I = lp["i_w"].shape[1]
    ts = _seq_tile(S)
    kern = functools.partial(_ffn_block_kernel, eps)
    inv = functools.partial(_spec, invariant=True)
    return pl.pallas_call(
        kern,
        out_shape=jax.ShapeDtypeStruct((B, S, Hs), jnp.float32),
        grid=(B, S // ts),
        in_specs=[
            pl.BlockSpec((1, ts, Hs), lambda b, s: (b, s, 0)),
            inv((Hs, I), lambda b, s: (0, 0)),                   # i_w (bf16)
            inv((1, I), lambda b, s: (0, 0)),
            inv((I, Hs), lambda b, s: (0, 0)),                   # o_w (bf16)
            inv((1, Hs), lambda b, s: (0, 0)),
            inv((1, Hs), lambda b, s: (0, 0)),
            inv((1, Hs), lambda b, s: (0, 0)),
        ],
        out_specs=pl.BlockSpec((1, ts, Hs), lambda b, s: (b, s, 0)),
        compiler_params=pltpu.CompilerParams(
            dimension_semantics=("parallel", "parallel"),
            vmem_limit_bytes=_VMEM_LIMIT),
    )(h, lp["i_w"], lp["i_b"].reshape(1, I), lp["o_w"], lp["o_b"].reshape(1, Hs),
      lp["out_ln_g"].reshape(1, Hs), lp["out_ln_b"].reshape(1, Hs))


def _mlm_transform_kernel(eps, x_ref, w_ref, b_ref, g_ref, beta_ref, o_ref):
    """Fused MLM head transform: LayerNorm(gelu(x @ w + b))."""
    x = x_ref[...]
    t = jnp.dot(x.astype(jnp.bfloat16), w_ref[...],
                preferred_element_type=jnp.float32) + b_ref[...]
    t = jax.nn.gelu(t, approximate=True)
    mu = jnp.mean(t, axis=-1, keepdims=True)
    var = jnp.mean((t - mu) ** 2, axis=-1, keepdims=True)
    o_ref[...] = ((t - mu) * lax.rsqrt(var + eps) * g_ref[...]
                  + beta_ref[...]).astype(o_ref.dtype)


def pallas_mlm_transform(x, w, b, ln_g, ln_b, eps=1e-12):
    M, Hs = x.shape
    kern = functools.partial(_mlm_transform_kernel, eps)
    return pl.pallas_call(
        kern,
        out_shape=jax.ShapeDtypeStruct((M, Hs), jnp.float32),
        compiler_params=pltpu.CompilerParams(vmem_limit_bytes=_VMEM_LIMIT),
    )(x, w, b.reshape(1, Hs), ln_g.reshape(1, Hs), ln_b.reshape(1, Hs))


def _decoder_ce_kernel(vocab, t_ref, w_ref, b_ref, lab_ref, m_ref, l_ref, ll_ref):
    """One vocab tile of the decoder fused with masked-LM CE statistics.

    Online max / sumexp / label-column-logit accumulators ([M,1] each) stay
    resident in VMEM across the vocab-tile grid axis; the [M, V] logits are
    never materialized in HBM.
    """
    j = pl.program_id(0)

    @pl.when(j == 0)
    def _():
        m_ref[...] = jnp.full(m_ref.shape, -1e30, jnp.float32)
        l_ref[...] = jnp.zeros(l_ref.shape, jnp.float32)
        ll_ref[...] = jnp.zeros(ll_ref.shape, jnp.float32)

    logits = jnp.dot(t_ref[...], w_ref[...],
                     preferred_element_type=jnp.float32) + b_ref[...]     # [M, bn]
    M, bn = logits.shape
    col = lax.broadcasted_iota(jnp.int32, (M, bn), 1) + j * bn
    masked = jnp.where(col < vocab, logits, -1e30)        # exclude vocab padding

    m_prev = m_ref[...]
    m_new = jnp.maximum(m_prev, jnp.max(masked, axis=-1, keepdims=True))
    l_ref[...] = (l_ref[...] * jnp.exp(m_prev - m_new)
                  + jnp.sum(jnp.exp(masked - m_new), axis=-1, keepdims=True))
    m_ref[...] = m_new
    ll_ref[...] = ll_ref[...] + jnp.sum(
        jnp.where(col == lab_ref[...], logits, 0.0), axis=-1, keepdims=True)


def pallas_decoder_ce(t, dec_w, dec_b, labels_flat, vocab, *, block_n=1024):
    """Vocab-tiled decoder fused with cross-entropy statistics.

    t:[M,Hs] f32, dec_w:[Hs,Vp] bf16 (pre-padded at init), dec_b:[Vp] f32.
    Returns (row_max, row_sumexp, row_label_logit), each [M,1] f32.
    """
    M, Hs = t.shape
    Vp = dec_w.shape[1]
    bn, vp_expect = _decoder_tiles(vocab, block_n)
    assert Vp == vp_expect and Vp % bn == 0
    inv = functools.partial(_spec, invariant=True)
    kern = functools.partial(_decoder_ce_kernel, vocab)
    acc_spec = pl.BlockSpec((M, 1), lambda j: (0, 0))
    acc_shape = jax.ShapeDtypeStruct((M, 1), jnp.float32)
    return pl.pallas_call(
        kern,
        out_shape=(acc_shape, acc_shape, acc_shape),
        grid=(Vp // bn,),
        in_specs=[
            inv((M, Hs), lambda j: (0, 0)),             # activations (grid-invariant)
            pl.BlockSpec((Hs, bn), lambda j: (0, j)),   # bf16 weight stream (dbl-buffered)
            pl.BlockSpec((1, bn), lambda j: (0, j)),
            inv((M, 1), lambda j: (0, 0)),              # labels (grid-invariant)
        ],
        out_specs=(acc_spec, acc_spec, acc_spec),
        compiler_params=pltpu.CompilerParams(
            dimension_semantics=("arbitrary",),
            vmem_limit_bytes=_VMEM_LIMIT),
    )(t.astype(jnp.bfloat16), dec_w, dec_b.reshape(1, Vp),
      labels_flat.reshape(M, 1))


# ----------------------------- plain-JAX glue ------------------------------

def layer_norm(x, gamma, beta, eps=1e-12):
    mu = jnp.mean(x, axis=-1, keepdims=True)
    var = jnp.mean((x - mu) ** 2, axis=-1, keepdims=True)
    return (x - mu) * lax.rsqrt(var + eps) * gamma + beta


def _lstm_direction(x, wp, reverse):
    """One direction of one LSTM layer. x:[T,Din] -> [T,H].

    Left to XLA: latency-bound scalar-sized recurrences; extra pallas_calls
    would be pure launch overhead.
    """
    H = wp["w_hh"].shape[0]
    gx = x @ wp["w_ih"] + wp["b"]                    # gate pre-activations [T,4H]
    if reverse:
        gx = gx[::-1]

    def step(carry, g_x):
        h, c = carry
        g = g_x + h @ wp["w_hh"]
        i, f, gg, o = jnp.split(g, 4, axis=-1)
        i = jax.nn.sigmoid(i)
        f = jax.nn.sigmoid(f)
        gg = jnp.tanh(gg)
        o = jax.nn.sigmoid(o)
        c = f * c + i * gg
        h = o * jnp.tanh(c)
        return (h, c), h

    init = (jnp.zeros((H,), jnp.float32), jnp.zeros((H,), jnp.float32))
    _, hs = lax.scan(step, init, gx)
    if reverse:
        hs = hs[::-1]
    return hs


def prompt_encoder_forward(p, cfg):
    """PromptEncoder: embedding(arange) -> 2-layer biLSTM -> MLP.  [P,Hs]."""
    h = p["emb"]                                     # embedding(seq_indices)
    for layer in range(2):                           # dropout off (eval semantics)
        fwd = _lstm_direction(h, p[f"l{layer}_fwd"], reverse=False)
        bwd = _lstm_direction(h, p[f"l{layer}_bwd"], reverse=True)
        h = jnp.concatenate([fwd, bwd], axis=-1)     # [P, Hs]
    y = jnp.maximum(h @ p["mlp_w1"] + p["mlp_b1"], 0.0)
    y = y @ p["mlp_w2"] + p["mlp_b2"]
    return y                                         # squeeze() of [1,P,Hs]


def visual_encoder_forward(p, imgs, cfg):
    """VisualEncoder: backbone feature [bs,768] -> visual_mlp -> [bs,L,Hs]."""
    bs = imgs.shape[0]
    flat = imgs.reshape(bs, -1)                      # NCHW row-major flatten
    # TODO(synk): synthetic stand-in for timm backbone.forward_features (vit);
    #             tiny matmuls left to XLA (M=bs=2, launch-latency bound).
    feat = jnp.tanh(flat @ p["bb_w"] + p["bb_b"])                     # [bs, 768]
    ve = feat @ p["mlp_w"] + p["mlp_b"]                               # [bs, L*Hs]
    return ve.reshape(bs, cfg["img_token_len"], cfg["hidden"])


def bert_mlm_forward(p, inputs_embeds, attention_mask, labels, cfg):
    bs, S, Hs = inputs_embeds.shape
    NH = cfg["heads"]
    pos = p["pos_emb"][:S][None]
    typ = p["type_emb"][0][None, None]
    h = layer_norm(inputs_embeds + pos + typ, p["emb_ln_g"], p["emb_ln_b"])
    # additive mask stays f32 inside the kernels (only MXU operands go bf16)
    bias = (1.0 - attention_mask.astype(jnp.float32))[:, None, :] * -1e9  # [bs,1,S]

    for lp in p["layers"]:
        h = pallas_attention_block(h, bias, lp, NH)
        h = pallas_ffn_block(h, lp)

    t = pallas_mlm_transform(h.reshape(bs * S, Hs), p["mlm_t_w"], p["mlm_t_b"],
                             p["mlm_ln_g"], p["mlm_ln_b"])
    m, l, ll = pallas_decoder_ce(t, p["dec_w"], p["dec_b"],
                                 labels.reshape(-1), cfg["vocab"])
    # per-position NLL = logsumexp(logits) - logit[label]; no [bs,S,V] in HBM
    nll = (m + jnp.log(l) - ll).reshape(bs, S)
    return nll, t


def embed_input(params, input_ids, imgs, cfg):
    bs, S = input_ids.shape
    P, L, Hs = cfg["prompt_token_len"], cfg["img_token_len"], cfg["hidden"]
    embeds = params["bert"]["word_emb"][input_ids]                  # [bs, S, Hs]
    bidx = jnp.arange(bs)[:, None]

    # prompt tokens (args.template == 3 path)
    _, pcols = jnp.nonzero(input_ids == cfg["prompt_token_id"], size=bs * P)
    prompt_pos = pcols.reshape(bs, P)
    prompt_embeds = prompt_encoder_forward(params["prompt"], cfg)   # [P, Hs]
    embeds = embeds.at[bidx, prompt_pos, :].set(
        jnp.broadcast_to(prompt_embeds[None], (bs, P, Hs)))

    # image tokens (not args.no_img path)
    _, icols = jnp.nonzero(input_ids == cfg["img_token_id"], size=bs * L)
    img_pos = icols.reshape(bs, L)
    visual_embeds = visual_encoder_forward(params["visual"], imgs, cfg)  # [bs,L,Hs]
    embeds = embeds.at[bidx, img_pos, :].set(visual_embeds)
    return embeds


def msa_forward(params, input_ids, attention_mask, labels, imgs, cfg):
    inputs_embeds = embed_input(params, input_ids, imgs, cfg)
    nll, t = bert_mlm_forward(params["bert"], inputs_embeds, attention_mask,
                              labels, cfg)

    # masked-LM loss (CrossEntropy with ignore_index = -100), fused CE stats
    valid = labels != -100
    loss = jnp.sum(jnp.where(valid, nll, 0.0)) / jnp.maximum(jnp.sum(valid), 1)

    # predictions at masked positions: only the few label-id columns are needed
    bs, S = input_ids.shape
    rows, cols = jnp.nonzero(valid, size=bs)
    t_rows = t[rows * S + cols]                                      # [bs, Hs]
    label_ids = jnp.asarray(cfg["label_id_list"], jnp.int32)
    w_lab = params["bert"]["dec_w"][:, label_ids].astype(jnp.float32)  # [Hs, K]
    b_lab = params["bert"]["dec_b"][label_ids]
    probs = t_rows @ w_lab + b_lab                                   # logits @ labels
    pred_labels_idx = jnp.argmax(probs, axis=-1)
    y_hat = label_ids[pred_labels_idx]
    y = labels[rows, cols]
    return loss, y_hat, y


# ----------------------------- parameter init ------------------------------

def _normal(key, shape, std=0.02):
    return std * jax.random.normal(key, shape, jnp.float32)


def init_params(key, cfg):
    Hs, V, Smax = cfg["hidden"], cfg["vocab"], cfg["max_seq"]
    NL, P, L = cfg["layers"], cfg["prompt_token_len"], cfg["img_token_len"]
    NH = cfg["heads"]
    keys = iter(jax.random.split(key, 256))
    nk = lambda: next(keys)
    bf16 = lambda a: a.astype(jnp.bfloat16)   # weights stored bf16: halves DMA + VMEM

    bn, Vp = _decoder_tiles(V)
    dec_w = jnp.pad(_normal(nk(), (Hs, V)), ((0, 0), (0, Vp - V)))
    dec_b = jnp.zeros((Vp,), jnp.float32)     # padded so decoder is always N-tiled

    bert = dict(
        word_emb=_normal(nk(), (V, Hs)),
        pos_emb=_normal(nk(), (Smax, Hs)),
        type_emb=_normal(nk(), (2, Hs)),
        emb_ln_g=jnp.ones((Hs,), jnp.float32), emb_ln_b=jnp.zeros((Hs,), jnp.float32),
        layers=[],
        mlm_t_w=bf16(_normal(nk(), (Hs, Hs))), mlm_t_b=jnp.zeros((Hs,), jnp.float32),
        mlm_ln_g=jnp.ones((Hs,), jnp.float32), mlm_ln_b=jnp.zeros((Hs,), jnp.float32),
        dec_w=bf16(dec_w), dec_b=dec_b,
    )
    scale = 1.0 / ((Hs // NH) ** 0.5)
    for _ in range(NL):
        q_w, k_w, v_w = (_normal(nk(), (Hs, Hs)), _normal(nk(), (Hs, Hs)),
                         _normal(nk(), (Hs, Hs)))
        bert["layers"].append(dict(
            # 1/sqrt(Dh) folded into Q proj; K/V fused; matmul weights pre-cast bf16
            q_w=bf16(q_w * scale), q_b=jnp.zeros((Hs,), jnp.float32),
            kv_w=bf16(jnp.concatenate([k_w, v_w], axis=1)),
            kv_b=jnp.zeros((2 * Hs,), jnp.float32),
            ao_w=bf16(_normal(nk(), (Hs, Hs))), ao_b=jnp.zeros((Hs,), jnp.float32),
            attn_ln_g=jnp.ones((Hs,), jnp.float32), attn_ln_b=jnp.zeros((Hs,), jnp.float32),
            i_w=bf16(_normal(nk(), (Hs, 4 * Hs))), i_b=jnp.zeros((4 * Hs,), jnp.float32),
            o_w=bf16(_normal(nk(), (4 * Hs, Hs))), o_b=jnp.zeros((Hs,), jnp.float32),
            out_ln_g=jnp.ones((Hs,), jnp.float32), out_ln_b=jnp.zeros((Hs,), jnp.float32),
        ))

    Hh = Hs // 2
    prompt = dict(
        emb=_normal(nk(), (P, Hs)),
        mlp_w1=_normal(nk(), (Hs, Hs)), mlp_b1=jnp.zeros((Hs,), jnp.float32),
        mlp_w2=_normal(nk(), (Hs, Hs)), mlp_b2=jnp.zeros((Hs,), jnp.float32),
    )
    for layer in range(2):
        din = Hs if layer == 0 else 2 * Hh
        for name in ("fwd", "bwd"):
            prompt[f"l{layer}_{name}"] = dict(
                w_ih=_normal(nk(), (din, 4 * Hh)),
                w_hh=_normal(nk(), (Hh, 4 * Hh)),
                b=jnp.zeros((4 * Hh,), jnp.float32),
            )

    feat_dim = 768  # ViT feature width expected by visual_mlp
    cin = cfg["img_ch"] * cfg["img_hw"] * cfg["img_hw"]
    visual = dict(
        bb_w=_normal(nk(), (cin, feat_dim)), bb_b=jnp.zeros((feat_dim,), jnp.float32),
        mlp_w=_normal(nk(), (feat_dim, L * Hs)), mlp_b=jnp.zeros((L * Hs,), jnp.float32),
    )
    return dict(bert=bert, prompt=prompt, visual=visual)


# --------------------------------- main -------------------------------------

if __name__ == "__main__":
    PAD, CLS, SEP, MASK, IMG_TOK, PROMPT_TOK = 0, 1, 2, 3, 4, 5
    cfg = dict(
        vocab=64, hidden=32, heads=4, layers=2, max_seq=16,
        prompt_token_len=3, img_token_len=2,
        prompt_token_id=PROMPT_TOK, img_token_id=IMG_TOK,
        label_id_list=[10, 11, 12],
        img_ch=3, img_hw=16,
    )
    bs, S = 2, 16

    key = jax.random.PRNGKey(0)
    k_params, k_tok, k_img = jax.random.split(key, 3)
    params = init_params(k_params, cfg)

    # deterministic example inputs
    input_ids = jax.random.randint(k_tok, (bs, S), 6, cfg["vocab"], dtype=jnp.int32)
    input_ids = input_ids.at[:, 0].set(CLS)
    input_ids = input_ids.at[:, 4:4 + cfg["prompt_token_len"]].set(PROMPT_TOK)
    input_ids = input_ids.at[:, 7:7 + cfg["img_token_len"]].set(IMG_TOK)
    input_ids = input_ids.at[:, 9].set(MASK)
    input_ids = input_ids.at[:, 14].set(SEP)
    input_ids = input_ids.at[:, 15].set(PAD)

    attention_mask = jnp.ones((bs, S), jnp.int32).at[:, 15].set(0)
    labels = jnp.full((bs, S), -100, jnp.int32)
    labels = labels.at[:, 9].set(
        jnp.asarray([cfg["label_id_list"][b % len(cfg["label_id_list"])]
                     for b in range(bs)], jnp.int32))
    imgs = jax.random.normal(k_img, (bs, cfg["img_ch"], cfg["img_hw"], cfg["img_hw"]),
                             jnp.float32)

    fwd = jax.jit(functools.partial(msa_forward, cfg=cfg))
    loss, y_hat, y = fwd(params, input_ids, attention_mask, labels, imgs)
    jax.block_until_ready((loss, y_hat, y))

    _ = (float(loss), y_hat.tolist(), y.tolist())  # mirrors (loss, y_, y.tolist())
    print("KERNEL_OK")
</pallas_src>

<mosaic_0001>
module attributes {stable_mosaic.version = 11 : i64} {
  func.func private @main(%arg0: i32) attributes {dimension_semantics = [#tpu.dimension_semantics<core_parallel>], iteration_bounds = array<i64: 2>, tpu.core_type = #tpu.core_type<sc_scalar_subcore>, window_params = []} {
    return
  }
}

module attributes {stable_mosaic.version = 11 : i64} {
  func.func private @main(%arg0: i32) attributes {dimension_semantics = [#tpu.dimension_semantics<core_parallel>], iteration_bounds = array<i64: 2>, tpu.core_type = #tpu.core_type<sc_scalar_subcore>, window_params = []} {
    return
  }
}

module attributes {stable_mosaic.version = 11 : i64} {
  func.func @_attn_block_kernel(%arg0: i32, %arg1: i32, %arg2: memref<1x8x32xf32, #tpu.memory_space<vmem>>, %arg3: memref<1x16x32xf32, #tpu.memory_space<vmem>>, %arg4: memref<1x1x16xf32, #tpu.memory_space<vmem>>, %arg5: memref<32x32xbf16, #tpu.memory_space<vmem>>, %arg6: memref<1x32xf32, #tpu.memory_space<vmem>>, %arg7: memref<32x64xbf16, #tpu.memory_space<vmem>>, %arg8: memref<1x64xf32, #tpu.memory_space<vmem>>, %arg9: memref<32x32xbf16, #tpu.memory_space<vmem>>, %arg10: memref<1x32xf32, #tpu.memory_space<vmem>>, %arg11: memref<1x32xf32, #tpu.memory_space<vmem>>, %arg12: memref<1x32xf32, #tpu.memory_space<vmem>>, %arg13: memref<1x8x32xf32, #tpu.memory_space<vmem>>, %arg14: memref<8x32xf32, #tpu.memory_space<vmem>>) attributes {dimension_semantics = [#tpu.dimension_semantics<parallel>, #tpu.dimension_semantics<parallel>], iteration_bounds = array<i64: 2, 2>, scalar_prefetch = 0 : i64, scratch_operands = 1 : i64, tpu.core_type = #tpu.core_type<tc>, window_params = [{transform_indices = @transform_0, window_bounds = array<i64: 1, 8, 32>}, {transform_indices = @transform_1, window_bounds = array<i64: 1, 16, 32>}, {transform_indices = @transform_2, window_bounds = array<i64: 1, 1, 16>}, {pipeline_mode = #tpu.pipeline_mode<synchronous>, transform_indices = @transform_3, window_bounds = array<i64: 32, 32>}, {pipeline_mode = #tpu.pipeline_mode<synchronous>, transform_indices = @transform_4, window_bounds = array<i64: 1, 32>}, {pipeline_mode = #tpu.pipeline_mode<synchronous>, transform_indices = @transform_5, window_bounds = array<i64: 32, 64>}, {pipeline_mode = #tpu.pipeline_mode<synchronous>, transform_indices = @transform_6, window_bounds = array<i64: 1, 64>}, {pipeline_mode = #tpu.pipeline_mode<synchronous>, transform_indices = @transform_7, window_bounds = array<i64: 32, 32>}, {pipeline_mode = #tpu.pipeline_mode<synchronous>, transform_indices = @transform_8, window_bounds = array<i64: 1, 32>}, {pipeline_mode = #tpu.pipeline_mode<synchronous>, transform_indices = @transform_9, window_bounds = array<i64: 1, 32>}, {pipeline_mode = #tpu.pipeline_mode<synchronous>, transform_indices = @transform_10, window_bounds = array<i64: 1, 32>}, {transform_indices = @transform_11, window_bounds = array<i64: 1, 8, 32>}]} {
    %c0 = arith.constant 0 : index
    %c0_0 = arith.constant 0 : index
    %c0_1 = arith.constant 0 : index
    %0 = vector.load %arg2[%c0, %c0_0, %c0_1] : memref<1x8x32xf32, #tpu.memory_space<vmem>>, vector<1x8x32xf32>
    %1 = vector.shape_cast %0 : vector<1x8x32xf32> to vector<8x32xf32>
    %c0_2 = arith.constant 0 : index
    %c0_3 = arith.constant 0 : index
    %c0_4 = arith.constant 0 : index
    %2 = vector.load %arg3[%c0_2, %c0_3, %c0_4] : memref<1x16x32xf32, #tpu.memory_space<vmem>>, vector<1x16x32xf32>
    %3 = vector.shape_cast %2 : vector<1x16x32xf32> to vector<16x32xf32>
    %4 = arith.truncf %1 : vector<8x32xf32> to vector<8x32xbf16>
    %c0_5 = arith.constant 0 : index
    %c0_6 = arith.constant 0 : index
    %5 = vector.load %arg5[%c0_5, %c0_6] : memref<32x32xbf16, #tpu.memory_space<vmem>>, vector<32x32xbf16>
    %cst = arith.constant dense<0.000000e+00> : vector<8x32xf32>
    %6 = tpu.matmul %4, %5, %cst {dimension_numbers = #tpu.dot_dimension_numbers<[1], [0], [0], [1], [0, 0, 1, 1], [], []>} : vector<8x32xbf16>, vector<32x32xbf16>, vector<8x32xf32> -> vector<8x32xf32>
    %c0_7 = arith.constant 0 : index
    %c0_8 = arith.constant 0 : index
    %7 = vector.load %arg6[%c0_7, %c0_8] : memref<1x32xf32, #tpu.memory_space<vmem>>, vector<1x32xf32>
    %8 = vector.broadcast %7 : vector<1x32xf32> to vector<8x32xf32>
    %9 = arith.addf %6, %8 : vector<8x32xf32>
    %10 = arith.truncf %3 : vector<16x32xf32> to vector<16x32xbf16>
    %c0_9 = arith.constant 0 : index
    %c0_10 = arith.constant 0 : index
    %11 = vector.load %arg7[%c0_9, %c0_10] : memref<32x64xbf16, #tpu.memory_space<vmem>>, vector<32x64xbf16>
    %cst_11 = arith.constant dense<0.000000e+00> : vector<16x64xf32>
    %12 = tpu.matmul %10, %11, %cst_11 {dimension_numbers = #tpu.dot_dimension_numbers<[1], [0], [0], [1], [0, 0, 1, 1], [], []>} : vector<16x32xbf16>, vector<32x64xbf16>, vector<16x64xf32> -> vector<16x64xf32>
    %c0_12 = arith.constant 0 : index
    %c0_13 = arith.constant 0 : index
    %13 = vector.load %arg8[%c0_12, %c0_13] : memref<1x64xf32, #tpu.memory_space<vmem>>, vector<1x64xf32>
    %14 = vector.broadcast %13 : vector<1x64xf32> to vector<16x64xf32>
    %15 = arith.addf %12, %14 : vector<16x64xf32>
    %16 = arith.truncf %9 : vector<8x32xf32> to vector<8x32xbf16>
    %17 = vector.extract_strided_slice %15 {offsets = [0, 0], sizes = [16, 32], strides = [1, 1]} : vector<16x64xf32> to vector<16x32xf32>
    %18 = arith.truncf %17 : vector<16x32xf32> to vector<16x32xbf16>
    %19 = vector.extract_strided_slice %15 {offsets = [0, 32], sizes = [16, 32], strides = [1, 1]} : vector<16x64xf32> to vector<16x32xf32>
    %20 = arith.truncf %19 : vector<16x32xf32> to vector<16x32xbf16>
    %c0_14 = arith.constant 0 : index
    %c0_15 = arith.constant 0 : index
    %c0_16 = arith.constant 0 : index
    %21 = vector.load %arg4[%c0_14, %c0_15, %c0_16] : memref<1x1x16xf32, #tpu.memory_space<vmem>>, vector<1x1x16xf32>
    %22 = vector.shape_cast %21 : vector<1x1x16xf32> to vector<1x16xf32>
    %23 = vector.shape_cast %22 : vector<1x16xf32> to vector<1x16xf32>
    %24 = vector.broadcast %23 : vector<1x16xf32> to vector<8x16xf32>
    %25 = vector.extract_strided_slice %16 {offsets = [0, 0], sizes = [8, 8], strides = [1, 1]} : vector<8x32xbf16> to vector<8x8xbf16>
    %26 = vector.extract_strided_slice %18 {offsets = [0, 0], sizes = [16, 8], strides = [1, 1]} : vector<16x32xbf16> to vector<16x8xbf16>
    %27 = vector.extract_strided_slice %20 {offsets = [0, 0], sizes = [16, 8], strides = [1, 1]} : vector<16x32xbf16> to vector<16x8xbf16>
    %cst_17 = arith.constant dense<0.000000e+00> : vector<8x16xf32>
    %28 = tpu.matmul %25, %26, %cst_17 {dimension_numbers = #tpu.dot_dimension_numbers<[1], [1], [0], [0], [0, 0, 1, 0], [], []>} : vector<8x8xbf16>, vector<16x8xbf16>, vector<8x16xf32> -> vector<8x16xf32>
    %29 = arith.addf %28, %24 : vector<8x16xf32>
    %cst_18 = arith.constant dense<0xFF800000> : vector<8xf32>
    %30 = vector.multi_reduction <maximumf>, %29, %cst_18 [1] : vector<8x16xf32> to vector<8xf32>
    %31 = vector.shape_cast %30 : vector<8xf32> to vector<8x1xf32>
    %32 = vector.broadcast %31 : vector<8x1xf32> to vector<8x16xf32>
    %33 = arith.subf %29, %32 : vector<8x16xf32>
    %34 = math.exp %33 : vector<8x16xf32>
    %cst_19 = arith.constant dense<0.000000e+00> : vector<8xf32>
    %35 = vector.multi_reduction <add>, %34, %cst_19 [1] : vector<8x16xf32> to vector<8xf32>
    %36 = vector.shape_cast %35 : vector<8xf32> to vector<8x1xf32>
    %37 = tpu.reciprocal %36 {approx = true} : vector<8x1xf32> -> vector<8x1xf32>
    %38 = vector.broadcast %37 : vector<8x1xf32> to vector<8x16xf32>
    %39 = arith.mulf %34, %38 : vector<8x16xf32>
    %40 = arith.truncf %39 : vector<8x16xf32> to vector<8x16xbf16>
    %cst_20 = arith.constant dense<0.000000e+00> : vector<8x8xf32>
    %41 = tpu.matmul %40, %27, %cst_20 {dimension_numbers = #tpu.dot_dimension_numbers<[1], [0], [0], [1], [0, 0, 1, 1], [], []>} : vector<8x16xbf16>, vector<16x8xbf16>, vector<8x8xf32> -> vector<8x8xf32>
    %c0_21 = arith.constant 0 : index
    %c0_22 = arith.constant 0 : index
    %42 = vector.load %arg14[%c0_21, %c0_22] : memref<8x32xf32, #tpu.memory_space<vmem>>, vector<8x8xf32>
    tpu.vector_store %arg14[%c0_21, %c0_22], %41 {strides = array<i32>} : memref<8x32xf32, #tpu.memory_space<vmem>>, vector<8x8xf32>,
    %43 = vector.extract_strided_slice %16 {offsets = [0, 8], sizes = [8, 8], strides = [1, 1]} : vector<8x32xbf16> to vector<8x8xbf16>
    %44 = vector.extract_strided_slice %18 {offsets = [0, 8], sizes = [16, 8], strides = [1, 1]} : vector<16x32xbf16> to vector<16x8xbf16>
    %45 = vector.extract_strided_slice %20 {offsets = [0, 8], sizes = [16, 8], strides = [1, 1]} : vector<16x32xbf16> to vector<16x8xbf16>
    %cst_23 = arith.constant dense<0.000000e+00> : vector<8x16xf32>
    %46 = tpu.matmul %43, %44, %cst_23 {dimension_numbers = #tpu.dot_dimension_numbers<[1], [1], [0], [0], [0, 0, 1, 0], [], []>} : vector<8x8xbf16>, vector<16x8xbf16>, vector<8x16xf32> -> vector<8x16xf32>
    %47 = arith.addf %46, %24 : vector<8x16xf32>
    %cst_24 = arith.constant dense<0xFF800000> : vector<8xf32>
    %48 = vector.multi_reduction <maximumf>, %47, %cst_24 [1] : vector<8x16xf32> to vector<8xf32>
    %49 = vector.shape_cast %48 : vector<8xf32> to vector<8x1xf32>
    %50 = vector.broadcast %49 : vector<8x1xf32> to vector<8x16xf32>
    %51 = arith.subf %47, %50 : vector<8x16xf32>
    %52 = math.exp %51 : vector<8x16xf32>
    %cst_25 = arith.constant dense<0.000000e+00> : vector<8xf32>
    %53 = vector.multi_reduction <add>, %52, %cst_25 [1] : vector<8x16xf32> to vector<8xf32>
    %54 = vector.shape_cast %53 : vector<8xf32> to vector<8x1xf32>
    %55 = tpu.reciprocal %54 {approx = true} : vector<8x1xf32> -> vector<8x1xf32>
    %56 = vector.broadcast %55 : vector<8x1xf32> to vector<8x16xf32>
    %57 = arith.mulf %52, %56 : vector<8x16xf32>
    %58 = arith.truncf %57 : vector<8x16xf32> to vector<8x16xbf16>
    %cst_26 = arith.constant dense<0.000000e+00> : vector<8x8xf32>
    %59 = tpu.matmul %58, %45, %cst_26 {dimension_numbers = #tpu.dot_dimension_numbers<[1], [0], [0], [1], [0, 0, 1, 1], [], []>} : vector<8x16xbf16>, vector<16x8xbf16>, vector<8x8xf32> -> vector<8x8xf32>
    %c0_27 = arith.constant 0 : index
    %c8 = arith.constant 8 : index
    %60 = vector.load %arg14[%c0_27, %c8] : memref<8x32xf32, #tpu.memory_space<vmem>>, vector<8x8xf32>
    tpu.vector_store %arg14[%c0_27, %c8], %59 {strides = array<i32>} : memref<8x32xf32, #tpu.memory_space<vmem>>, vector<8x8xf32>,
    %61 = vector.extract_strided_slice %16 {offsets = [0, 16], sizes = [8, 8], strides = [1, 1]} : vector<8x32xbf16> to vector<8x8xbf16>
    %62 = vector.extract_strided_slice %18 {offsets = [0, 16], sizes = [16, 8], strides = [1, 1]} : vector<16x32xbf16> to vector<16x8xbf16>
    %63 = vector.extract_strided_slice %20 {offsets = [0, 16], sizes = [16, 8], strides = [1, 1]} : vector<16x32xbf16> to vector<16x8xbf16>
    %cst_28 = arith.constant dense<0.000000e+00> : vector<8x16xf32>
    %64 = tpu.matmul %61, %62, %cst_28 {dimension_numbers = #tpu.dot_dimension_numbers<[1], [1], [0], [0], [0, 0, 1, 0], [], []>} : vector<8x8xbf16>, vector<16x8xbf16>, vector<8x16xf32> -> vector<8x16xf32>
    %65 = arith.addf %64, %24 : vector<8x16xf32>
    %cst_29 = arith.constant dense<0xFF800000> : vector<8xf32>
    %66 = vector.multi_reduction <maximumf>, %65, %cst_29 [1] : vector<8x16xf32> to vector<8xf32>
    %67 = vector.shape_cast %66 : vector<8xf32> to vector<8x1xf32>
    %68 = vector.broadcast %67 : vector<8x1xf32> to vector<8x16xf32>
    %69 = arith.subf %65, %68 : vector<8x16xf32>
    %70 = math.exp %69 : vector<8x16xf32>
    %cst_30 = arith.constant dense<0.000000e+00> : vector<8xf32>
    %71 = vector.multi_reduction <add>, %70, %cst_30 [1] : vector<8x16xf32> to vector<8xf32>
    %72 = vector.shape_cast %71 : vector<8xf32> to vector<8x1xf32>
    %73 = tpu.reciprocal %72 {approx = true} : vector<8x1xf32> -> vector<8x1xf32>
    %74 = vector.broadcast %73 : vector<8x1xf32> to vector<8x16xf32>
    %75 = arith.mulf %70, %74 : vector<8x16xf32>
    %76 = arith.truncf %75 : vector<8x16xf32> to vector<8x16xbf16>
    %cst_31 = arith.constant dense<0.000000e+00> : vector<8x8xf32>
    %77 = tpu.matmul %76, %63, %cst_31 {dimension_numbers = #tpu.dot_dimension_numbers<[1], [0], [0], [1], [0, 0, 1, 1], [], []>} : vector<8x16xbf16>, vector<16x8xbf16>, vector<8x8xf32> -> vector<8x8xf32>
    %c0_32 = arith.constant 0 : index
    %c16 = arith.constant 16 : index
    %78 = vector.load %arg14[%c0_32, %c16] : memref<8x32xf32, #tpu.memory_space<vmem>>, vector<8x8xf32>
    tpu.vector_store %arg14[%c0_32, %c16], %77 {strides = array<i32>} : memref<8x32xf32, #tpu.memory_space<vmem>>, vector<8x8xf32>,
    %79 = vector.extract_strided_slice %16 {offsets = [0, 24], sizes = [8, 8], strides = [1, 1]} : vector<8x32xbf16> to vector<8x8xbf16>
    %80 = vector.extract_strided_slice %18 {offsets = [0, 24], sizes = [16, 8], strides = [1, 1]} : vector<16x32xbf16> to vector<16x8xbf16>
    %81 = vector.extract_strided_slice %20 {offsets = [0, 24], sizes = [16, 8], strides = [1, 1]} : vector<16x32xbf16> to vector<16x8xbf16>
    %cst_33 = arith.constant dense<0.000000e+00> : vector<8x16xf32>
    %82 = tpu.matmul %79, %80, %cst_33 {dimension_numbers = #tpu.dot_dimension_numbers<[1], [1], [0], [0], [0, 0, 1, 0], [], []>} : vector<8x8xbf16>, vector<16x8xbf16>, vector<8x16xf32> -> vector<8x16xf32>
    %83 = arith.addf %82, %24 : vector<8x16xf32>
    %cst_34 = arith.constant dense<0xFF800000> : vector<8xf32>
    %84 = vector.multi_reduction <maximumf>, %83, %cst_34 [1] : vector<8x16xf32> to vector<8xf32>
    %85 = vector.shape_cast %84 : vector<8xf32> to vector<8x1xf32>
    %86 = vector.broadcast %85 : vector<8x1xf32> to vector<8x16xf32>
    %87 = arith.subf %83, %86 : vector<8x16xf32>
    %88 = math.exp %87 : vector<8x16xf32>
    %cst_35 = arith.constant dense<0.000000e+00> : vector<8xf32>
    %89 = vector.multi_reduction <add>, %88, %cst_35 [1] : vector<8x16xf32> to vector<8xf32>
    %90 = vector.shape_cast %89 : vector<8xf32> to vector<8x1xf32>
    %91 = tpu.reciprocal %90 {approx = true} : vector<8x1xf32> -> vector<8x1xf32>
    %92 = vector.broadcast %91 : vector<8x1xf32> to vector<8x16xf32>
    %93 = arith.mulf %88, %92 : vector<8x16xf32>
    %94 = arith.truncf %93 : vector<8x16xf32> to vector<8x16xbf16>
    %cst_36 = arith.constant dense<0.000000e+00> : vector<8x8xf32>
    %95 = tpu.matmul %94, %81, %cst_36 {dimension_numbers = #tpu.dot_dimension_numbers<[1], [0], [0], [1], [0, 0, 1, 1], [], []>} : vector<8x16xbf16>, vector<16x8xbf16>, vector<8x8xf32> -> vector<8x8xf32>
    %c0_37 = arith.constant 0 : index
    %c24 = arith.constant 24 : index
    %96 = vector.load %arg14[%c0_37, %c24] : memref<8x32xf32, #tpu.memory_space<vmem>>, vector<8x8xf32>
    tpu.vector_store %arg14[%c0_37, %c24], %95 {strides = array<i32>} : memref<8x32xf32, #tpu.memory_space<vmem>>, vector<8x8xf32>,
    %c0_38 = arith.constant 0 : index
    %c0_39 = arith.constant 0 : index
    %97 = vector.load %arg14[%c0_38, %c0_39] : memref<8x32xf32, #tpu.memory_space<vmem>>, vector<8x32xf32>
    %98 = arith.truncf %97 : vector<8x32xf32> to vector<8x32xbf16>
    %c0_40 = arith.constant 0 : index
    %c0_41 = arith.constant 0 : index
    %99 = vector.load %arg9[%c0_40, %c0_41] : memref<32x32xbf16, #tpu.memory_space<vmem>>, vector<32x32xbf16>
    %cst_42 = arith.constant dense<0.000000e+00> : vector<8x32xf32>
    %100 = tpu.matmul %98, %99, %cst_42 {dimension_numbers = #tpu.dot_dimension_numbers<[1], [0], [0], [1], [0, 0, 1, 1], [], []>} : vector<8x32xbf16>, vector<32x32xbf16>, vector<8x32xf32> -> vector<8x32xf32>
    %c0_43 = arith.constant 0 : index
    %c0_44 = arith.constant 0 : index
    %101 = vector.load %arg10[%c0_43, %c0_44] : memref<1x32xf32, #tpu.memory_space<vmem>>, vector<1x32xf32>
    %102 = vector.broadcast %101 : vector<1x32xf32> to vector<8x32xf32>
    %103 = arith.addf %100, %102 : vector<8x32xf32>
    %104 = arith.addf %1, %103 : vector<8x32xf32>
    %cst_45 = arith.constant dense<0.000000e+00> : vector<8xf32>
    %105 = vector.multi_reduction <add>, %104, %cst_45 [1] : vector<8x32xf32> to vector<8xf32>
    %106 = vector.shape_cast %105 : vector<8xf32> to vector<8x1xf32>
    %cst_46 = arith.constant 3.200000e+01 : f32
    %107 = vector.broadcast %cst_46 : f32 to vector<8x1xf32>
    %108 = arith.divf %106, %107 : vector<8x1xf32>
    %109 = vector.broadcast %108 : vector<8x1xf32> to vector<8x32xf32>
    %110 = arith.subf %104, %109 : vector<8x32xf32>
    %111 = arith.mulf %110, %110 : vector<8x32xf32>
    %cst_47 = arith.constant dense<0.000000e+00> : vector<8xf32>
    %112 = vector.multi_reduction <add>, %111, %cst_47 [1] : vector<8x32xf32> to vector<8xf32>
    %113 = vector.shape_cast %112 : vector<8xf32> to vector<8x1xf32>
    %cst_48 = arith.constant 3.200000e+01 : f32
    %114 = vector.broadcast %cst_48 : f32 to vector<8x1xf32>
    %115 = arith.divf %113, %114 : vector<8x1xf32>
    %116 = vector.broadcast %108 : vector<8x1xf32> to vector<8x32xf32>
    %117 = arith.subf %104, %116 : vector<8x32xf32>
    %cst_49 = arith.constant 9.99999996E-13 : f32
    %118 = vector.broadcast %cst_49 : f32 to vector<8x1xf32>
    %119 = arith.addf %115, %118 : vector<8x1xf32>
    %120 = math.rsqrt %119 : vector<8x1xf32>
    %121 = vector.broadcast %120 : vector<8x1xf32> to vector<8x32xf32>
    %122 = arith.mulf %117, %121 : vector<8x32xf32>
    %c0_50 = arith.constant 0 : index
    %c0_51 = arith.constant 0 : index
    %123 = vector.load %arg11[%c0_50, %c0_51] : memref<1x32xf32, #tpu.memory_space<vmem>>, vector<1x32xf32>
    %124 = vector.broadcast %123 : vector<1x32xf32> to vector<8x32xf32>
    %125 = arith.mulf %122, %124 : vector<8x32xf32>
    %c0_52 = arith.constant 0 : index
    %c0_53 = arith.constant 0 : index
    %126 = vector.load %arg12[%c0_52, %c0_53] : memref<1x32xf32, #tpu.memory_space<vmem>>, vector<1x32xf32>
    %127 = vector.broadcast %126 : vector<1x32xf32> to vector<8x32xf32>
    %128 = arith.addf %125, %127 : vector<8x32xf32>
    %c0_54 = arith.constant 0 : index
    %c0_55 = arith.constant 0 : index
    %c0_56 = arith.constant 0 : index
    %129 = vector.load %arg13[%c0_54, %c0_55, %c0_56] : memref<1x8x32xf32, #tpu.memory_space<vmem>>, vector<1x8x32xf32>
    %130 = vector.shape_cast %129 : vector<1x8x32xf32> to vector<8x32xf32>
    %131 = vector.shape_cast %128 : vector<8x32xf32> to vector<1x8x32xf32>
    tpu.vector_store %arg13[%c0_54, %c0_55, %c0_56], %131 {strides = array<i32>} : memref<1x8x32xf32, #tpu.memory_space<vmem>>, vector<1x8x32xf32>,
    return
  }
  func.func @transform_0(%arg0: i32, %arg1: i32) -> (i32, i32, i32) {
    %c0_i32 = arith.constant 0 : i32
    %c0_i32_0 = arith.constant 0 : i32
    return %arg0, %arg1, %c0_i32 : i32, i32, i32
  }
  func.func @transform_1(%arg0: i32, %arg1: i32) -> (i32, i32, i32) {
    %c0_i32 = arith.constant 0 : i32
    %c0_i32_0 = arith.constant 0 : i32
    %c0_i32_1 = arith.constant 0 : i32
    return %arg0, %c0_i32, %c0_i32_0 : i32, i32, i32
  }
  func.func @transform_2(%arg0: i32, %arg1: i32) -> (i32, i32, i32) {
    %c0_i32 = arith.constant 0 : i32
    %c0_i32_0 = arith.constant 0 : i32
    %c0_i32_1 = arith.constant 0 : i32
    return %arg0, %c0_i32, %c0_i32_0 : i32, i32, i32
  }
  func.func @transform_3(%arg0: i32, %arg1: i32) -> (i32, i32) {
    %c0_i32 = arith.constant 0 : i32
    %c0_i32_0 = arith.constant 0 : i32
    %c0_i32_1 = arith.constant 0 : i32
    return %c0_i32, %c0_i32_0 : i32, i32
  }
  func.func @transform_4(%arg0: i32, %arg1: i32) -> (i32, i32) {
    %c0_i32 = arith.constant 0 : i32
    %c0_i32_0 = arith.constant 0 : i32
    %c0_i32_1 = arith.constant 0 : i32
    return %c0_i32, %c0_i32_0 : i32, i32
  }
  func.func @transform_5(%arg0: i32, %arg1: i32) -> (i32, i32) {
    %c0_i32 = arith.constant 0 : i32
    %c0_i32_0 = arith.constant 0 : i32
    %c0_i32_1 = arith.constant 0 : i32
    return %c0_i32, %c0_i32_0 : i32, i32
  }
  func.func @transform_6(%arg0: i32, %arg1: i32) -> (i32, i32) {
    %c0_i32 = arith.constant 0 : i32
    %c0_i32_0 = arith.constant 0 : i32
    %c0_i32_1 = arith.constant 0 : i32
    return %c0_i32, %c0_i32_0 : i32, i32
  }
  func.func @transform_7(%arg0: i32, %arg1: i32) -> (i32, i32) {
    %c0_i32 = arith.constant 0 : i32
    %c0_i32_0 = arith.constant 0 : i32
    %c0_i32_1 = arith.constant 0 : i32
    return %c0_i32, %c0_i32_0 : i32, i32
  }
  func.func @transform_8(%arg0: i32, %arg1: i32) -> (i32, i32) {
    %c0_i32 = arith.constant 0 : i32
    %c0_i32_0 = arith.constant 0 : i32
    %c0_i32_1 = arith.constant 0 : i32
    return %c0_i32, %c0_i32_0 : i32, i32
  }
  func.func @transform_9(%arg0: i32, %arg1: i32) -> (i32, i32) {
    %c0_i32 = arith.constant 0 : i32
    %c0_i32_0 = arith.constant 0 : i32
    %c0_i32_1 = arith.constant 0 : i32
    return %c0_i32, %c0_i32_0 : i32, i32
  }
  func.func @transform_10(%arg0: i32, %arg1: i32) -> (i32, i32) {
    %c0_i32 = arith.constant 0 : i32
    %c0_i32_0 = arith.constant 0 : i32
    %c0_i32_1 = arith.constant 0 : i32
    return %c0_i32, %c0_i32_0 : i32, i32
  }
  func.func @transform_11(%arg0: i32, %arg1: i32) -> (i32, i32, i32) {
    %c0_i32 = arith.constant 0 : i32
    %c0_i32_0 = arith.constant 0 : i32
    return %arg0, %arg1, %c0_i32 : i32, i32, i32
  }
}

module attributes {stable_mosaic.version = 11 : i64} {
  func.func @_mlm_transform_kernel(%arg0: memref<32x32xf32, #tpu.memory_space<vmem>>, %arg1: memref<32x32xbf16, #tpu.memory_space<vmem>>, %arg2: memref<1x32xf32, #tpu.memory_space<vmem>>, %arg3: memref<1x32xf32, #tpu.memory_space<vmem>>, %arg4: memref<1x32xf32, #tpu.memory_space<vmem>>, %arg5: memref<32x32xf32, #tpu.memory_space<vmem>>) attributes {dimension_semantics = [], scalar_prefetch = 0 : i64, scratch_operands = 0 : i64, tpu.core_type = #tpu.core_type<tc>} {
    %c0 = arith.constant 0 : index
    %c0_0 = arith.constant 0 : index
    %0 = vector.load %arg0[%c0, %c0_0] : memref<32x32xf32, #tpu.memory_space<vmem>>, vector<32x32xf32>
    %1 = arith.truncf %0 : vector<32x32xf32> to vector<32x32xbf16>
    %c0_1 = arith.constant 0 : index
    %c0_2 = arith.constant 0 : index
    %2 = vector.load %arg1[%c0_1, %c0_2] : memref<32x32xbf16, #tpu.memory_space<vmem>>, vector<32x32xbf16>
    %cst = arith.constant dense<0.000000e+00> : vector<32x32xf32>
    %3 = tpu.matmul %1, %2, %cst {dimension_numbers = #tpu.dot_dimension_numbers<[1], [0], [0], [1], [0, 0, 1, 1], [], []>} : vector<32x32xbf16>, vector<32x32xbf16>, vector<32x32xf32> -> vector<32x32xf32>
    %c0_3 = arith.constant 0 : index
    %c0_4 = arith.constant 0 : index
    %4 = vector.load %arg2[%c0_3, %c0_4] : memref<1x32xf32, #tpu.memory_space<vmem>>, vector<1x32xf32>
    %5 = vector.broadcast %4 : vector<1x32xf32> to vector<32x32xf32>
    %6 = arith.addf %3, %5 : vector<32x32xf32>
    %7 = arith.mulf %6, %6 : vector<32x32xf32>
    %8 = arith.mulf %6, %7 : vector<32x32xf32>
    %cst_5 = arith.constant 4.471500e-02 : f32
    %9 = vector.broadcast %cst_5 : f32 to vector<32x32xf32>
    %10 = arith.mulf %9, %8 : vector<32x32xf32>
    %11 = arith.addf %6, %10 : vector<32x32xf32>
    %cst_6 = arith.constant 0.797884583 : f32
    %12 = vector.broadcast %cst_6 : f32 to vector<32x32xf32>
    %13 = arith.mulf %12, %11 : vector<32x32xf32>
    %14 = math.tanh %13 : vector<32x32xf32>
    %cst_7 = arith.constant 1.000000e+00 : f32
    %15 = vector.broadcast %cst_7 : f32 to vector<32x32xf32>
    %16 = arith.addf %15, %14 : vector<32x32xf32>
    %cst_8 = arith.constant 5.000000e-01 : f32
    %17 = vector.broadcast %cst_8 : f32 to vector<32x32xf32>
    %18 = arith.mulf %17, %16 : vector<32x32xf32>
    %19 = arith.mulf %6, %18 : vector<32x32xf32>
    %cst_9 = arith.constant dense<0.000000e+00> : vector<32xf32>
    %20 = vector.multi_reduction <add>, %19, %cst_9 [1] : vector<32x32xf32> to vector<32xf32>
    %21 = vector.shape_cast %20 : vector<32xf32> to vector<32x1xf32>
    %cst_10 = arith.constant 3.200000e+01 : f32
    %22 = vector.broadcast %cst_10 : f32 to vector<32x1xf32>
    %23 = arith.divf %21, %22 : vector<32x1xf32>
    %24 = vector.broadcast %23 : vector<32x1xf32> to vector<32x32xf32>
    %25 = arith.subf %19, %24 : vector<32x32xf32>
    %26 = arith.mulf %25, %25 : vector<32x32xf32>
    %cst_11 = arith.constant dense<0.000000e+00> : vector<32xf32>
    %27 = vector.multi_reduction <add>, %26, %cst_11 [1] : vector<32x32xf32> to vector<32xf32>
    %28 = vector.shape_cast %27 : vector<32xf32> to vector<32x1xf32>
    %cst_12 = arith.constant 3.200000e+01 : f32
    %29 = vector.broadcast %cst_12 : f32 to vector<32x1xf32>
    %30 = arith.divf %28, %29 : vector<32x1xf32>
    %31 = vector.broadcast %23 : vector<32x1xf32> to vector<32x32xf32>
    %32 = arith.subf %19, %31 : vector<32x32xf32>
    %cst_13 = arith.constant 9.99999996E-13 : f32
    %33 = vector.broadcast %cst_13 : f32 to vector<32x1xf32>
    %34 = arith.addf %30, %33 : vector<32x1xf32>
    %35 = math.rsqrt %34 : vector<32x1xf32>
    %36 = vector.broadcast %35 : vector<32x1xf32> to vector<32x32xf32>
    %37 = arith.mulf %32, %36 : vector<32x32xf32>
    %c0_14 = arith.constant 0 : index
    %c0_15 = arith.constant 0 : index
    %38 = vector.load %arg3[%c0_14, %c0_15] : memref<1x32xf32, #tpu.memory_space<vmem>>, vector<1x32xf32>
    %39 = vector.broadcast %38 : vector<1x32xf32> to vector<32x32xf32>
    %40 = arith.mulf %37, %39 : vector<32x32xf32>
    %c0_16 = arith.constant 0 : index
    %c0_17 = arith.constant 0 : index
    %41 = vector.load %arg4[%c0_16, %c0_17] : memref<1x32xf32, #tpu.memory_space<vmem>>, vector<1x32xf32>
    %42 = vector.broadcast %41 : vector<1x32xf32> to vector<32x32xf32>
    %43 = arith.addf %40, %42 : vector<32x32xf32>
    %c0_18 = arith.constant 0 : index
    %c0_19 = arith.constant 0 : index
    %44 = vector.load %arg5[%c0_18, %c0_19] : memref<32x32xf32, #tpu.memory_space<vmem>>, vector<32x32xf32>
    tpu.vector_store %arg5[%c0_18, %c0_19], %43 {strides = array<i32>} : memref<32x32xf32, #tpu.memory_space<vmem>>, vector<32x32xf32>,
    return
  }
}

module attributes {stable_mosaic.version = 11 : i64} {
  func.func @_ffn_block_kernel(%arg0: i32, %arg1: i32, %arg2: memref<1x8x32xf32, #tpu.memory_space<vmem>>, %arg3: memref<32x128xbf16, #tpu.memory_space<vmem>>, %arg4: memref<1x128xf32, #tpu.memory_space<vmem>>, %arg5: memref<128x32xbf16, #tpu.memory_space<vmem>>, %arg6: memref<1x32xf32, #tpu.memory_space<vmem>>, %arg7: memref<1x32xf32, #tpu.memory_space<vmem>>, %arg8: memref<1x32xf32, #tpu.memory_space<vmem>>, %arg9: memref<1x8x32xf32, #tpu.memory_space<vmem>>) attributes {dimension_semantics = [#tpu.dimension_semantics<parallel>, #tpu.dimension_semantics<parallel>], iteration_bounds = array<i64: 2, 2>, scalar_prefetch = 0 : i64, scratch_operands = 0 : i64, tpu.core_type = #tpu.core_type<tc>, window_params = [{transform_indices = @transform_0, window_bounds = array<i64: 1, 8, 32>}, {pipeline_mode = #tpu.pipeline_mode<synchronous>, transform_indices = @transform_1, window_bounds = array<i64: 32, 128>}, {pipeline_mode = #tpu.pipeline_mode<synchronous>, transform_indices = @transform_2, window_bounds = array<i64: 1, 128>}, {pipeline_mode = #tpu.pipeline_mode<synchronous>, transform_indices = @transform_3, window_bounds = array<i64: 128, 32>}, {pipeline_mode = #tpu.pipeline_mode<synchronous>, transform_indices = @transform_4, window_bounds = array<i64: 1, 32>}, {pipeline_mode = #tpu.pipeline_mode<synchronous>, transform_indices = @transform_5, window_bounds = array<i64: 1, 32>}, {pipeline_mode = #tpu.pipeline_mode<synchronous>, transform_indices = @transform_6, window_bounds = array<i64: 1, 32>}, {transform_indices = @transform_7, window_bounds = array<i64: 1, 8, 32>}]} {
    %c0 = arith.constant 0 : index
    %c0_0 = arith.constant 0 : index
    %c0_1 = arith.constant 0 : index
    %0 = vector.load %arg2[%c0, %c0_0, %c0_1] : memref<1x8x32xf32, #tpu.memory_space<vmem>>, vector<1x8x32xf32>
    %1 = vector.shape_cast %0 : vector<1x8x32xf32> to vector<8x32xf32>
    %2 = arith.truncf %1 : vector<8x32xf32> to vector<8x32xbf16>
    %c0_2 = arith.constant 0 : index
    %c0_3 = arith.constant 0 : index
    %3 = vector.load %arg3[%c0_2, %c0_3] : memref<32x128xbf16, #tpu.memory_space<vmem>>, vector<32x128xbf16>
    %cst = arith.constant dense<0.000000e+00> : vector<8x128xf32>
    %4 = tpu.matmul %2, %3, %cst {dimension_numbers = #tpu.dot_dimension_numbers<[1], [0], [0], [1], [0, 0, 1, 1], [], []>} : vector<8x32xbf16>, vector<32x128xbf16>, vector<8x128xf32> -> vector<8x128xf32>
    %c0_4 = arith.constant 0 : index
    %c0_5 = arith.constant 0 : index
    %5 = vector.load %arg4[%c0_4, %c0_5] : memref<1x128xf32, #tpu.memory_space<vmem>>, vector<1x128xf32>
    %6 = vector.broadcast %5 : vector<1x128xf32> to vector<8x128xf32>
    %7 = arith.addf %4, %6 : vector<8x128xf32>
    %8 = arith.mulf %7, %7 : vector<8x128xf32>
    %9 = arith.mulf %7, %8 : vector<8x128xf32>
    %cst_6 = arith.constant 4.471500e-02 : f32
    %10 = vector.broadcast %cst_6 : f32 to vector<8x128xf32>
    %11 = arith.mulf %10, %9 : vector<8x128xf32>
    %12 = arith.addf %7, %11 : vector<8x128xf32>
    %cst_7 = arith.constant 0.797884583 : f32
    %13 = vector.broadcast %cst_7 : f32 to vector<8x128xf32>
    %14 = arith.mulf %13, %12 : vector<8x128xf32>
    %15 = math.tanh %14 : vector<8x128xf32>
    %cst_8 = arith.constant 1.000000e+00 : f32
    %16 = vector.broadcast %cst_8 : f32 to vector<8x128xf32>
    %17 = arith.addf %16, %15 : vector<8x128xf32>
    %cst_9 = arith.constant 5.000000e-01 : f32
    %18 = vector.broadcast %cst_9 : f32 to vector<8x128xf32>
    %19 = arith.mulf %18, %17 : vector<8x128xf32>
    %20 = arith.mulf %7, %19 : vector<8x128xf32>
    %21 = arith.truncf %20 : vector<8x128xf32> to vector<8x128xbf16>
    %c0_10 = arith.constant 0 : index
    %c0_11 = arith.constant 0 : index
    %22 = vector.load %arg5[%c0_10, %c0_11] : memref<128x32xbf16, #tpu.memory_space<vmem>>, vector<128x32xbf16>
    %cst_12 = arith.constant dense<0.000000e+00> : vector<8x32xf32>
    %23 = tpu.matmul %21, %22, %cst_12 {dimension_numbers = #tpu.dot_dimension_numbers<[1], [0], [0], [1], [0, 0, 1, 1], [], []>} : vector<8x128xbf16>, vector<128x32xbf16>, vector<8x32xf32> -> vector<8x32xf32>
    %c0_13 = arith.constant 0 : index
    %c0_14 = arith.constant 0 : index
    %24 = vector.load %arg6[%c0_13, %c0_14] : memref<1x32xf32, #tpu.memory_space<vmem>>, vector<1x32xf32>
    %25 = vector.broadcast %24 : vector<1x32xf32> to vector<8x32xf32>
    %26 = arith.addf %23, %25 : vector<8x32xf32>
    %27 = arith.addf %1, %26 : vector<8x32xf32>
    %cst_15 = arith.constant dense<0.000000e+00> : vector<8xf32>
    %28 = vector.multi_reduction <add>, %27, %cst_15 [1] : vector<8x32xf32> to vector<8xf32>
    %29 = vector.shape_cast %28 : vector<8xf32> to vector<8x1xf32>
    %cst_16 = arith.constant 3.200000e+01 : f32
    %30 = vector.broadcast %cst_16 : f32 to vector<8x1xf32>
    %31 = arith.divf %29, %30 : vector<8x1xf32>
    %32 = vector.broadcast %31 : vector<8x1xf32> to vector<8x32xf32>
    %33 = arith.subf %27, %32 : vector<8x32xf32>
    %34 = arith.mulf %33, %33 : vector<8x32xf32>
    %cst_17 = arith.constant dense<0.000000e+00> : vector<8xf32>
    %35 = vector.multi_reduction <add>, %34, %cst_17 [1] : vector<8x32xf32> to vector<8xf32>
    %36 = vector.shape_cast %35 : vector<8xf32> to vector<8x1xf32>
    %cst_18 = arith.constant 3.200000e+01 : f32
    %37 = vector.broadcast %cst_18 : f32 to vector<8x1xf32>
    %38 = arith.divf %36, %37 : vector<8x1xf32>
    %39 = vector.broadcast %31 : vector<8x1xf32> to vector<8x32xf32>
    %40 = arith.subf %27, %39 : vector<8x32xf32>
    %cst_19 = arith.constant 9.99999996E-13 : f32
    %41 = vector.broadcast %cst_19 : f32 to vector<8x1xf32>
    %42 = arith.addf %38, %41 : vector<8x1xf32>
    %43 = math.rsqrt %42 : vector<8x1xf32>
    %44 = vector.broadcast %43 : vector<8x1xf32> to vector<8x32xf32>
    %45 = arith.mulf %40, %44 : vector<8x32xf32>
    %c0_20 = arith.constant 0 : index
    %c0_21 = arith.constant 0 : index
    %46 = vector.load %arg7[%c0_20, %c0_21] : memref<1x32xf32, #tpu.memory_space<vmem>>, vector<1x32xf32>
    %47 = vector.broadcast %46 : vector<1x32xf32> to vector<8x32xf32>
    %48 = arith.mulf %45, %47 : vector<8x32xf32>
    %c0_22 = arith.constant 0 : index
    %c0_23 = arith.constant 0 : index
    %49 = vector.load %arg8[%c0_22, %c0_23] : memref<1x32xf32, #tpu.memory_space<vmem>>, vector<1x32xf32>
    %50 = vector.broadcast %49 : vector<1x32xf32> to vector<8x32xf32>
    %51 = arith.addf %48, %50 : vector<8x32xf32>
    %c0_24 = arith.constant 0 : index
    %c0_25 = arith.constant 0 : index
    %c0_26 = arith.constant 0 : index
    %52 = vector.load %arg9[%c0_24, %c0_25, %c0_26] : memref<1x8x32xf32, #tpu.memory_space<vmem>>, vector<1x8x32xf32>
    %53 = vector.shape_cast %52 : vector<1x8x32xf32> to vector<8x32xf32>
    %54 = vector.shape_cast %51 : vector<8x32xf32> to vector<1x8x32xf32>
    tpu.vector_store %arg9[%c0_24, %c0_25, %c0_26], %54 {strides = array<i32>} : memref<1x8x32xf32, #tpu.memory_space<vmem>>, vector<1x8x32xf32>,
    return
  }
  func.func @transform_0(%arg0: i32, %arg1: i32) -> (i32, i32, i32) {
    %c0_i32 = arith.constant 0 : i32
    %c0_i32_0 = arith.constant 0 : i32
    return %arg0, %arg1, %c0_i32 : i32, i32, i32
  }
  func.func @transform_1(%arg0: i32, %arg1: i32) -> (i32, i32) {
    %c0_i32 = arith.constant 0 : i32
    %c0_i32_0 = arith.constant 0 : i32
    %c0_i32_1 = arith.constant 0 : i32
    return %c0_i32, %c0_i32_0 : i32, i32
  }
  func.func @transform_2(%arg0: i32, %arg1: i32) -> (i32, i32) {
    %c0_i32 = arith.constant 0 : i32
    %c0_i32_0 = arith.constant 0 : i32
    %c0_i32_1 = arith.constant 0 : i32
    return %c0_i32, %c0_i32_0 : i32, i32
  }
  func.func @transform_3(%arg0: i32, %arg1: i32) -> (i32, i32) {
    %c0_i32 = arith.constant 0 : i32
    %c0_i32_0 = arith.constant 0 : i32
    %c0_i32_1 = arith.constant 0 : i32
    return %c0_i32, %c0_i32_0 : i32, i32
  }
  func.func @transform_4(%arg0: i32, %arg1: i32) -> (i32, i32) {
    %c0_i32 = arith.constant 0 : i32
    %c0_i32_0 = arith.constant 0 : i32
    %c0_i32_1 = arith.constant 0 : i32
    return %c0_i32, %c0_i32_0 : i32, i32
  }
  func.func @transform_5(%arg0: i32, %arg1: i32) -> (i32, i32) {
    %c0_i32 = arith.constant 0 : i32
    %c0_i32_0 = arith.constant 0 : i32
    %c0_i32_1 = arith.constant 0 : i32
    return %c0_i32, %c0_i32_0 : i32, i32
  }
  func.func @transform_6(%arg0: i32, %arg1: i32) -> (i32, i32) {
    %c0_i32 = arith.constant 0 : i32
    %c0_i32_0 = arith.constant 0 : i32
    %c0_i32_1 = arith.constant 0 : i32
    return %c0_i32, %c0_i32_0 : i32, i32
  }
  func.func @transform_7(%arg0: i32, %arg1: i32) -> (i32, i32, i32) {
    %c0_i32 = arith.constant 0 : i32
    %c0_i32_0 = arith.constant 0 : i32
    return %arg0, %arg1, %c0_i32 : i32, i32, i32
  }
}

module attributes {stable_mosaic.version = 11 : i64} {
  func.func @_decoder_ce_kernel(%arg0: i32, %arg1: memref<32x32xbf16, #tpu.memory_space<vmem>>, %arg2: memref<32x128xbf16, #tpu.memory_space<vmem>>, %arg3: memref<1x128xf32, #tpu.memory_space<vmem>>, %arg4: memref<32x1xi32, #tpu.memory_space<vmem>>, %arg5: memref<32x1xf32, #tpu.memory_space<vmem>>, %arg6: memref<32x1xf32, #tpu.memory_space<vmem>>, %arg7: memref<32x1xf32, #tpu.memory_space<vmem>>) attributes {dimension_semantics = [#tpu.dimension_semantics<arbitrary>], iteration_bounds = array<i64: 1>, scalar_prefetch = 0 : i64, scratch_operands = 0 : i64, tpu.core_type = #tpu.core_type<tc>, window_params = [{pipeline_mode = #tpu.pipeline_mode<synchronous>, transform_indices = @transform_0, window_bounds = array<i64: 32, 32>}, {transform_indices = @transform_1, window_bounds = array<i64: 32, 128>}, {transform_indices = @transform_2, window_bounds = array<i64: 1, 128>}, {pipeline_mode = #tpu.pipeline_mode<synchronous>, transform_indices = @transform_3, window_bounds = array<i64: 32, 1>}, {pipeline_mode = #tpu.pipeline_mode<synchronous>, transform_indices = @transform_4, window_bounds = array<i64: 32, 1>}, {pipeline_mode = #tpu.pipeline_mode<synchronous>, transform_indices = @transform_5, window_bounds = array<i64: 32, 1>}, {pipeline_mode = #tpu.pipeline_mode<synchronous>, transform_indices = @transform_6, window_bounds = array<i64: 32, 1>}]} {
    %c0_i32 = arith.constant 0 : i32
    %0 = arith.cmpi eq, %arg0, %c0_i32 : i32
    %1 = arith.extui %0 : i1 to i32
    %c0_i32_0 = arith.constant 0 : i32
    %2 = arith.cmpi ne, %1, %c0_i32_0 : i32
    scf.if %2 {
      %cst_25 = arith.constant -1.000000e+30 : f32
      %43 = vector.broadcast %cst_25 : f32 to vector<32x1xf32>
      %c0_26 = arith.constant 0 : index
      %c0_27 = arith.constant 0 : index
      %44 = vector.load %arg5[%c0_26, %c0_27] : memref<32x1xf32, #tpu.memory_space<vmem>>, vector<32x1xf32>
      tpu.vector_store %arg5[%c0_26, %c0_27], %43 {strides = array<i32>} : memref<32x1xf32, #tpu.memory_space<vmem>>, vector<32x1xf32>,
      %cst_28 = arith.constant 0.000000e+00 : f32
      %45 = vector.broadcast %cst_28 : f32 to vector<32x1xf32>
      %c0_29 = arith.constant 0 : index
      %c0_30 = arith.constant 0 : index
      %46 = vector.load %arg6[%c0_29, %c0_30] : memref<32x1xf32, #tpu.memory_space<vmem>>, vector<32x1xf32>
      tpu.vector_store %arg6[%c0_29, %c0_30], %45 {strides = array<i32>} : memref<32x1xf32, #tpu.memory_space<vmem>>, vector<32x1xf32>,
      %cst_31 = arith.constant 0.000000e+00 : f32
      %47 = vector.broadcast %cst_31 : f32 to vector<32x1xf32>
      %c0_32 = arith.constant 0 : index
      %c0_33 = arith.constant 0 : index
      %48 = vector.load %arg7[%c0_32, %c0_33] : memref<32x1xf32, #tpu.memory_space<vmem>>, vector<32x1xf32>
      tpu.vector_store %arg7[%c0_32, %c0_33], %47 {strides = array<i32>} : memref<32x1xf32, #tpu.memory_space<vmem>>, vector<32x1xf32>,
    } else {
    }
    %c0 = arith.constant 0 : index
    %c0_1 = arith.constant 0 : index
    %3 = vector.load %arg1[%c0, %c0_1] : memref<32x32xbf16, #tpu.memory_space<vmem>>, vector<32x32xbf16>
    %c0_2 = arith.constant 0 : index
    %c0_3 = arith.constant 0 : index
    %4 = vector.load %arg2[%c0_2, %c0_3] : memref<32x128xbf16, #tpu.memory_space<vmem>>, vector<32x128xbf16>
    %cst = arith.constant dense<0.000000e+00> : vector<32x128xf32>
    %5 = tpu.matmul %3, %4, %cst {dimension_numbers = #tpu.dot_dimension_numbers<[1], [0], [0], [1], [0, 0, 1, 1], [], []>} : vector<32x32xbf16>, vector<32x128xbf16>, vector<32x128xf32> -> vector<32x128xf32>
    %c0_4 = arith.constant 0 : index
    %c0_5 = arith.constant 0 : index
    %6 = vector.load %arg3[%c0_4, %c0_5] : memref<1x128xf32, #tpu.memory_space<vmem>>, vector<1x128xf32>
    %7 = vector.broadcast %6 : vector<1x128xf32> to vector<32x128xf32>
    %8 = arith.addf %5, %7 : vector<32x128xf32>
    %9 = tpu.iota {dimensions = array<i32: 1>} : vector<32x128xi32>
    %c128_i32 = arith.constant 128 : i32
    %10 = arith.muli %arg0, %c128_i32 : i32
    %11 = vector.broadcast %10 : i32 to vector<32x128xi32>
    %12 = arith.addi %9, %11 : vector<32x128xi32>
    %c64_i32 = arith.constant 64 : i32
    %13 = vector.broadcast %c64_i32 : i32 to vector<32x128xi32>
    %14 = arith.cmpi slt, %12, %13 : vector<32x128xi32>
    %cst_6 = arith.constant -1.000000e+30 : f32
    %15 = vector.broadcast %cst_6 : f32 to vector<32x128xf32>
    %16 = arith.select %14, %8, %15 : vector<32x128xi1>, vector<32x128xf32>
    %c0_7 = arith.constant 0 : index
    %c0_8 = arith.constant 0 : index
    %17 = vector.load %arg5[%c0_7, %c0_8] : memref<32x1xf32, #tpu.memory_space<vmem>>, vector<32x1xf32>
    %cst_9 = arith.constant dense<0xFF800000> : vector<32xf32>
    %18 = vector.multi_reduction <maximumf>, %16, %cst_9 [1] : vector<32x128xf32> to vector<32xf32>
    %19 = vector.shape_cast %18 : vector<32xf32> to vector<32x1xf32>
    %20 = arith.maximumf %17, %19 : vector<32x1xf32>
    %c0_10 = arith.constant 0 : index
    %c0_11 = arith.constant 0 : index
    %21 = vector.load %arg6[%c0_10, %c0_11] : memref<32x1xf32, #tpu.memory_space<vmem>>, vector<32x1xf32>
    %22 = arith.subf %17, %20 : vector<32x1xf32>
    %23 = math.exp %22 : vector<32x1xf32>
    %24 = arith.mulf %21, %23 : vector<32x1xf32>
    %25 = vector.broadcast %20 : vector<32x1xf32> to vector<32x128xf32>
    %26 = arith.subf %16, %25 : vector<32x128xf32>
    %27 = math.exp %26 : vector<32x128xf32>
    %cst_12 = arith.constant dense<0.000000e+00> : vector<32xf32>
    %28 = vector.multi_reduction <add>, %27, %cst_12 [1] : vector<32x128xf32> to vector<32xf32>
    %29 = vector.shape_cast %28 : vector<32xf32> to vector<32x1xf32>
    %30 = arith.addf %24, %29 : vector<32x1xf32>
    %c0_13 = arith.constant 0 : index
    %c0_14 = arith.constant 0 : index
    %31 = vector.load %arg6[%c0_13, %c0_14] : memref<32x1xf32, #tpu.memory_space<vmem>>, vector<32x1xf32>
    tpu.vector_store %arg6[%c0_13, %c0_14], %30 {strides = array<i32>} : memref<32x1xf32, #tpu.memory_space<vmem>>, vector<32x1xf32>,
    %c0_15 = arith.constant 0 : index
    %c0_16 = arith.constant 0 : index
    %32 = vector.load %arg5[%c0_15, %c0_16] : memref<32x1xf32, #tpu.memory_space<vmem>>, vector<32x1xf32>
    tpu.vector_store %arg5[%c0_15, %c0_16], %20 {strides = array<i32>} : memref<32x1xf32, #tpu.memory_space<vmem>>, vector<32x1xf32>,
    %c0_17 = arith.constant 0 : index
    %c0_18 = arith.constant 0 : index
    %33 = vector.load %arg7[%c0_17, %c0_18] : memref<32x1xf32, #tpu.memory_space<vmem>>, vector<32x1xf32>
    %c0_19 = arith.constant 0 : index
    %c0_20 = arith.constant 0 : index
    %34 = vector.load %arg4[%c0_19, %c0_20] : memref<32x1xi32, #tpu.memory_space<vmem>>, vector<32x1xi32>
    %35 = vector.broadcast %34 : vector<32x1xi32> to vector<32x128xi32>
    %36 = arith.cmpi eq, %12, %35 : vector<32x128xi32>
    %cst_21 = arith.constant 0.000000e+00 : f32
    %37 = vector.broadcast %cst_21 : f32 to vector<32x128xf32>
    %38 = arith.select %36, %8, %37 : vector<32x128xi1>, vector<32x128xf32>
    %cst_22 = arith.constant dense<0.000000e+00> : vector<32xf32>
    %39 = vector.multi_reduction <add>, %38, %cst_22 [1] : vector<32x128xf32> to vector<32xf32>
    %40 = vector.shape_cast %39 : vector<32xf32> to vector<32x1xf32>
    %41 = arith.addf %33, %40 : vector<32x1xf32>
    %c0_23 = arith.constant 0 : index
    %c0_24 = arith.constant 0 : index
    %42 = vector.load %arg7[%c0_23, %c0_24] : memref<32x1xf32, #tpu.memory_space<vmem>>, vector<32x1xf32>
    tpu.vector_store %arg7[%c0_23, %c0_24], %41 {strides = array<i32>} : memref<32x1xf32, #tpu.memory_space<vmem>>, vector<32x1xf32>,
    return
  }
  func.func @transform_0(%arg0: i32) -> (i32, i32) {
    %c0_i32 = arith.constant 0 : i32
    %c0_i32_0 = arith.constant 0 : i32
    %c0_i32_1 = arith.constant 0 : i32
    return %c0_i32, %c0_i32_0 : i32, i32
  }
  func.func @transform_1(%arg0: i32) -> (i32, i32) {
    %c0_i32 = arith.constant 0 : i32
    %c0_i32_0 = arith.constant 0 : i32
    return %c0_i32, %arg0 : i32, i32
  }
  func.func @transform_2(%arg0: i32) -> (i32, i32) {
    %c0_i32 = arith.constant 0 : i32
    %c0_i32_0 = arith.constant 0 : i32
    return %c0_i32, %arg0 : i32, i32
  }
  func.func @transform_3(%arg0: i32) -> (i32, i32) {
    %c0_i32 = arith.constant 0 : i32
    %c0_i32_0 = arith.constant 0 : i32
    %c0_i32_1 = arith.constant 0 : i32
    return %c0_i32, %c0_i32_0 : i32, i32
  }
  func.func @transform_4(%arg0: i32) -> (i32, i32) {
    %c0_i32 = arith.constant 0 : i32
    %c0_i32_0 = arith.constant 0 : i32
    %c0_i32_1 = arith.constant 0 : i32
    return %c0_i32, %c0_i32_0 : i32, i32
  }
  func.func @transform_5(%arg0: i32) -> (i32, i32) {
    %c0_i32 = arith.constant 0 : i32
    %c0_i32_0 = arith.constant 0 : i32
    %c0_i32_1 = arith.constant 0 : i32
    return %c0_i32, %c0_i32_0 : i32, i32
  }
  func.func @transform_6(%arg0: i32) -> (i32, i32) {
    %c0_i32 = arith.constant 0 : i32
    %c0_i32_0 = arith.constant 0 : i32
    %c0_i32_1 = arith.constant 0 : i32
    return %c0_i32, %c0_i32_0 : i32, i32
  }
}

</mosaic_0001>

<bundles_post_ra>
// kernel: custom-call.8
= control target key start
LH: loop header
LB: loop body
LE: loop exit
PB: predicated region body
PF: predicated region fallthrough
CT: control target
= control target key end

     0   :  { %s6_s0 = inlined_call_operand.vmem [shape: f32[16], index: 0, kind: output, shape index: {}]  }

// kernel: msa_forward.10
= control target key start
LH: loop header
LB: loop body
LE: loop exit
PB: predicated region body
PF: predicated region fallthrough
CT: control target
= control target key end

     0   :  { %vm50_vm0 = vcmask 261120   ;;  %s345_s1 = inlined_call_operand.vmem [shape: bf16[32,32], index: 1, kind: input, shape index: {}]   ;;  %s346_s0 = inlined_call_operand.vmem [shape: f32[32,32], index: 0, kind: input, shape index: {}]   ;;  %s347_s2 = inlined_call_operand.vmem [shape: f32[1,32], index: 2, kind: input, shape index: {}]   ;;  %s348_s3 = inlined_call_operand.vmem [shape: f32[1,32], index: 3, kind: input, shape index: {}]   ;;  %s349_s4 = inlined_call_operand.vmem [shape: f32[1,32], index: 4, kind: input, shape index: {}]   ;;  %s350_s5 = inlined_call_operand.vmem [shape: f32[32,32], index: 5, kind: output, shape index: {}]  }
   0x1   :  { %v244_v0 = vld [vmem:[%s345_s1] sm:$0xff]   ;;  %v245_v1 = vld [vmem:[%s345_s1 + $0x8] sm:$0xff]   ;;  %v23_v5 = vld [vmem:[%s346_s0 + $0x10] sm:$0xff] }
   0x2   :  { %236 = vmatprep.subr.bf16.mxu0 %v244_v0  ;;  %v21_v2 = vld [vmem:[%s346_s0] sm:$0xff]  ;;  %v22_v3 = vld [vmem:[%s346_s0 + $0x8] sm:$0xff]  ;;  %v24_v6 = vld [vmem:[%s346_s0 + $0x18] sm:$0xff] }
   0x3   :  { %237 = vmatpush3.bf16.msra.mxu0 %v244_v0  ;;  %v25_v4 = vpack.c.bf16 %v22_v3, %v21_v2  ;;  %v26_v7 = vpack.c.bf16 %v24_v6, %v23_v5  ;;  %v225_v8 = vld [vmem:[%s347_s2] ss:$0 sm:$0xff] }
   0x4   :  { %238 = vmatprep.subr.bf16.mxu0 %v245_v1 }
   0x5   :  { %240 = vmatprep.mubr.msk.bf16.mxu0 %vm50_vm0, %v25_v4 }
   0x7   :  { %239 = vmatpush3.bf16.msra.mxu0 %v245_v1 }
   0xa   :  { %241 = vmatmul.mubr.msk.bf16.vlgmr.msra.gmra.mrb[0].mxu0 %vm50_vm0, %v26_v7 }
  0xdd   :  { %v242_v9 = vpop.f32.mrb[0].mxu0 }
  0xde   :  { %v100_v10 = vadd.f32 %v242_v9, %v225_v8  ;;  %v91_v11 = vpop.f32.mrb[1].mxu0 }
  0xdf   :  { %v92_v12 = vadd.f32 %v225_v8, %v91_v11  ;;  %v243_v13 = vpop.f32.mrb[2].mxu0 }
  0xe0   :  { %v108_v14 = vmul.f32 %v100_v10, %v100_v10  ;;  %v103_v15 = vadd.f32 %v243_v13, %v225_v8  ;;  %v94_v16 = vpop.f32.mrb[3].mxu0 }
  0xe1   :  { %v106_v17 = vmul.f32 %v92_v12, %v92_v12  ;;  %v95_v18 = vadd.f32 %v225_v8, %v94_v16 }
  0xe2   :  { %v112_v19 = vmul.f32 %v108_v14, %v100_v10  ;;  %v109_v20 = vmul.f32 %v103_v15, %v103_v15 }
  0xe3   :  { %v110_v21 = vmul.f32 %v106_v17, %v92_v12  ;;  %v107_v22 = vmul.f32 %v95_v18, %v95_v18 }
  0xe4   :  { %v116_v23 = vmul.f32 0.044715, %v112_v19  ;;  %v113_v24 = vmul.f32 %v109_v20, %v103_v15 }
  0xe5   :  { %v114_v25 = vmul.f32 0.044715, %v110_v21  ;;  %v111_v26 = vmul.f32 %v107_v22, %v95_v18 }
  0xe6   :  { %v117_v27 = vmul.f32 0.044715, %v113_v24  ;;  %v120_v28 = vadd.f32 %v116_v23, %v100_v10 }
  0xe7   :  { %v115_v29 = vmul.f32 0.044715, %v111_v26  ;;  %v118_v30 = vadd.f32 %v114_v25, %v92_v12  ;;  %v230_v26 = vld [vmem:[%s348_s3] ss:$0 sm:$0xff] }
  0xe8   :  { %v121_v31 = vadd.f32 %v117_v27, %v103_v15  ;;  %v124_v32 = vmul.f32 0.7978846, %v120_v28  ;;  %v231_v28 = vld [vmem:[%s349_s4] ss:$0 sm:$0xff] }
  0xe9   :  { %v119_v33 = vadd.f32 %v115_v29, %v95_v18  ;;  %v122_v34 = vmul.f32 0.7978846, %v118_v30 }
  0xea   :  { %246 = vtanh.f32 %v124_v32  ;;  %v125_v35 = vmul.f32 0.7978846, %v121_v31 }
  0xeb   :  { %248 = vtanh.f32 %v122_v34  ;;  %v123_v36 = vmul.f32 0.7978846, %v119_v33 }
  0xec   :  { %250 = vtanh.f32 %v125_v35 }
  0xed   :  { %252 = vtanh.f32 %v123_v36 }
  0xf4   :  { %v247_v37 = vpop.eup %246 }
  0xf5   :  { %v249_v38 = vpop.eup %248  ;;  %v132_v39 = vadd.f32 1.0, %v247_v37 }
  0xf6   :  { %v251_v40 = vpop.eup %250  ;;  %v130_v41 = vadd.f32 1.0, %v249_v38 }
  0xf7   :  { %v253_v42 = vpop.eup %252  ;;  %v136_v43 = vmul.f32 0.5, %v132_v39  ;;  %v133_v44 = vadd.f32 1.0, %v251_v40 }
  0xf8   :  { %v134_v45 = vmul.f32 0.5, %v130_v41  ;;  %v131_v46 = vadd.f32 1.0, %v253_v42 }
  0xf9   :  { %v140_v47 = vmul.f32 %v136_v43, %v100_v10  ;;  %v137_v48 = vmul.f32 0.5, %v133_v44 }
  0xfa   :  { %v138_v49 = vmul.f32 %v134_v45, %v92_v12  ;;  %v135_v50 = vmul.f32 0.5, %v131_v46 }
  0xfb   :  { %v148_v51 = vsel %vm50_vm0, %v140_v47, 0.0  ;;  %v141_v52 = vmul.f32 %v137_v48, %v103_v15 }
  0xfc   :  { %149 = vadd.xlane.f32.xlu1 %v148_v51  ;;  %v142_v53 = vsel %vm50_vm0, %v138_v49, 0.0  ;;  %v139_v54 = vmul.f32 %v135_v50, %v95_v18 }
  0xfd   :  { %143 = vadd.xlane.f32.xlu0 %v142_v53  ;;  %v151_v55 = vsel %vm50_vm0, %v141_v52, 0.0 }
  0xfe   :  { %v145_v56 = vsel %vm50_vm0, %v139_v54, 0.0 }
 0x100   :  { %152 = vadd.xlane.f32.xlu1 %v151_v55 }
 0x101   :  { %146 = vadd.xlane.f32.xlu0 %v145_v56 }
 0x189   :  { %v150_v57 = vpop.xlane.xlu1 %149 }
 0x18a   :  { %v157_v58 = vmul.f32 0.03125, %v150_v57  ;;  %v144_v59 = vpop.xlane.xlu0 %143 }
 0x18b   :  { %v155_v60 = vmul.f32 0.03125, %v144_v59 }
 0x18c   :  { %v161_v61 = vsub.f32 %v140_v47, %v157_v58 }
 0x18d   :  { %v159_v62 = vsub.f32 %v138_v49, %v155_v60  ;;  %v153_v63 = vpop.xlane.xlu1 %152 }
 0x18e   :  { %v158_v0 = vmul.f32 0.03125, %v153_v63  ;;  %v147_v1 = vpop.xlane.xlu0 %146  ;;  %v165_v7 = vmul.f32 %v161_v61, %v161_v61 }
 0x18f   :  { %v156_v2 = vmul.f32 0.03125, %v147_v1  ;;  %v163_v3 = vmul.f32 %v159_v62, %v159_v62 }
 0x190   :  { %v162_v4 = vsub.f32 %v141_v52, %v158_v0  ;;  %v173_v9 = vsel %vm50_vm0, %v165_v7, 0.0 }
 0x191   :  { %v160_v5 = vsub.f32 %v139_v54, %v156_v2  ;;  %v167_v6 = vsel %vm50_vm0, %v163_v3, 0.0 }
 0x192   :  { %168 = vadd.xlane.f32.xlu0 %v167_v6  ;;  %v166_v11 = vmul.f32 %v162_v4, %v162_v4 }
 0x193   :  { %v164_v8 = vmul.f32 %v160_v5, %v160_v5 }
 0x194   :  { %v176_v12 = vsel %vm50_vm0, %v166_v11, 0.0 }
 0x195   :  { %v170_v10 = vsel %vm50_vm0, %v164_v8, 0.0 }
 0x196   :  { %174 = vadd.xlane.f32.xlu0 %v173_v9  ;;  %171 = vadd.xlane.f32.xlu1 %v170_v10 }
 0x19a   :  { %177 = vadd.xlane.f32.xlu1 %v176_v12 }
 0x21f   :  { %v169_v13 = vpop.xlane.xlu0 %168 }
 0x220   :  { %v179_v14 = vmul.f32 0.03125, %v169_v13 }
 0x222   :  { %v183_v15 = vadd.f32 1e-12, %v179_v14 }
 0x223   :  { %v172_v16 = vpop.xlane.xlu1 %171  ;;  %v175_v17 = vpop.xlane.xlu0 %174 }
 0x224   :  { %254 = vrsqrt.f32 %v183_v15  ;;  %v180_v18 = vmul.f32 0.03125, %v172_v16  ;;  %v181_v19 = vmul.f32 0.03125, %v175_v17 }
 0x226   :  { %v184_v20 = vadd.f32 1e-12, %v180_v18  ;;  %v185_v21 = vadd.f32 1e-12, %v181_v19 }
 0x227   :  { %v178_v22 = vpop.xlane.xlu1 %177 }
 0x228   :  { %256 = vrsqrt.f32 %v184_v20  ;;  %v182_v23 = vmul.f32 0.03125, %v178_v22 }
 0x229   :  { %258 = vrsqrt.f32 %v185_v21 }
 0x22a   :  { %v186_v24 = vadd.f32 1e-12, %v182_v23 }
 0x22c   :  { %260 = vrsqrt.f32 %v186_v24 }
 0x22e   :  { %v255_v25 = vpop.eup %254 }
 0x22f   :  { %v191_v27 = vmul.f32 %v255_v25, %v159_v62 }
 0x231   :  { %v202_v29 = vmul.f32 %v230_v26, %v191_v27 }
 0x232   :  { %v257_v30 = vpop.eup %256 }
 0x233   :  { %v259_v31 = vpop.eup %258  ;;  %v213_v32 = vadd.f32 %v231_v28, %v202_v29  ;;  %v192_v33 = vmul.f32 %v257_v30, %v160_v5 }
 0x234   :  { %v193_v34 = vmul.f32 %v259_v31, %v161_v61 }
 0x235   :  { %217 = vst.msk [vmem:[%s350_s5] sm:$0xff] %vm50_vm0, %v213_v32  ;;  %v203_v35 = vmul.f32 %v230_v26, %v192_v33 }
 0x236   :  { %v261_v36 = vpop.eup %260  ;;  %v204_v37 = vmul.f32 %v230_v26, %v193_v34 }
 0x237   :  { %v214_v38 = vadd.f32 %v231_v28, %v203_v35  ;;  %v194_v39 = vmul.f32 %v261_v36, %v162_v4 }
 0x238   :  { %v215_v40 = vadd.f32 %v231_v28, %v204_v37 }
 0x239   :  { %218 = vst.msk [vmem:[%s350_s5 + $0x8] sm:$0xff] %vm50_vm0, %v214_v38  ;;  %v205_v41 = vmul.f32 %v230_v26, %v194_v39 }
 0x23a   :  { %219 = vst.msk [vmem:[%s350_s5 + $0x10] sm:$0xff] %vm50_vm0, %v215_v40 }
 0x23b   :  { %v216_v42 = vadd.f32 %v231_v28, %v205_v41 }
 0x23d   :  { %220 = vst.msk [vmem:[%s350_s5 + $0x18] sm:$0xff] %vm50_vm0, %v216_v42 }

// kernel: msa_forward.7
= control target key start
LH: loop header
LB: loop body
LE: loop exit
PB: predicated region body
PF: predicated region fallthrough
CT: control target
= control target key end

     0   :  { %s823_s24 = smov 0   ;;  %s825_s25 = smov 0   ;;  %s927_s0 = inlined_call_operand.vmem [shape: f32[2,16,32], index: 0, kind: input, shape index: {}]   ;;  %s928_s1 = inlined_call_operand.vmem [shape: bf16[32,128], index: 1, kind: input, shape index: {}]   ;;  %s929_s2 = inlined_call_operand.vmem [shape: f32[1,128], index: 2, kind: input, shape index: {}]   ;;  %s930_s3 = inlined_call_operand.vmem [shape: bf16[128,32], index: 3, kind: input, shape index: {}]   ;;  %s931_s4 = inlined_call_operand.vmem [shape: f32[1,32], index: 4, kind: input, shape index: {}]   ;;  %s932_s5 = inlined_call_operand.vmem [shape: f32[1,32], index: 5, kind: input, shape index: {}]   ;;  %s933_s6 = inlined_call_operand.vmem [shape: f32[1,32], index: 6, kind: input, shape index: {}]   ;;  %s934_s7 = inlined_call_operand.vmem [shape: f32[2,16,32], index: 7, kind: output, shape index: {}]  }
   0x1   :  { %s827_s26 = smov 0   ;;  %s829_s27 = smov 0  }
   0x2   :  { %s831_s28 = smov 0  }
   0x3 LB: > { %s26_s29 = sadd.s32 1, %s771_s26  ;;  %s29_s30 = sadd.s32 1, %s775_s27  ;;  %s779_s28 = sphi %s831_s28, %s17_s28   ;;  %s775_s27 = sphi %s829_s27, %s938_s27   ;;  %s771_s26 = sphi %s827_s26, %s937_s26   ;;  %s767_s25 = sphi %s825_s25, %s936_s25   ;;  %s763_s24 = sphi %s823_s24, %s935_s24  }
   0x4   : > { %p27_p0 = scmp.ge.s32.totalorder %s26_s29, 2  ;;  %p623_p1 = scmp.ge.s32.totalorder %s779_s28, 1 }
   0x5   : > { %p256_p2 = scmp.lt.s32.totalorder %s779_s28, 5 }
   0x6   : > { %s940_s29 = smov (%p27_p0, %s26_s29), 0  ;;  %s942_s30 = smov (!%p27_p0, %s29_s30), %s775_s27 }
   0x7   : > { %p257_p3 = pnand %p623_p1, %p256_p2  ;;  %p31_p4 = scmp.ge.s32.totalorder %s942_s30, 2 }
   0x8   : > { %v727_v0 = vld [vmem:[%s928_s1] sm:$0xff] (!%p257_p3)   ;;  %v781_v1 = vmov (!%p257_p3), 0.0   ;;  %v728_v2 = vld [vmem:[%s928_s1 + $0x8] sm:$0xff] (!%p257_p3)   ;;  %vm782_vm0 = vmmov (!%p257_p3), 0   ;;  %p294_p5 = scmp.lt.s32.totalorder (!%p257_p3), %s767_s25, 1  ;;  %p296_p6 = scmp.lt.s32.totalorder (!%p257_p3), %s763_s24, 1 }
   0x9   : > { %s944_s30 = smov (%p31_p4, %s942_s30), 0  ;;  %260 = sbr.rel (%p257_p3) target bundleno = 797 (0x31d), region = 48 }
   0xa   : > { %657 = vmatprep.subr.bf16.mxu0 (!%p257_p3), %v781_v1  ;;  %665 = vmatprep.subr.bf16.mxu1 (!%p257_p3), %v781_v1  ;;  %vm336_vm1 = vcmask (!%p257_p3), 261120   ;;  %v729_v5 = vld [vmem:[%s930_s3] sm:$0xff] (!%p257_p3)   ;;  %v730_v6 = vld [vmem:[%s930_s3 + $0x8] sm:$0xff] (!%p257_p3)   ;;  %v731_v7 = vld [vmem:[%s930_s3 + $0x10] sm:$0xff] (!%p257_p3)  }
   0xb   : > { %658 = vmatpush3.bf16.msra.mxu0 (!%p257_p3), %v727_v0  ;;  %661 = vmatprep.mubr.msk.bf16.mxu0 (!%p257_p3), %vm782_vm0, %v781_v1  ;;  %v732_v8 = vld [vmem:[%s930_s3 + $0x18] sm:$0xff] (!%p257_p3)   ;;  %v733_v9 = vld [vmem:[%s930_s3 + $0x20] sm:$0xff] (!%p257_p3)   ;;  %v734_v10 = vld [vmem:[%s930_s3 + $0x28] sm:$0xff] (!%p257_p3)  }
   0xc   : > { %659 = vmatprep.subr.bf16.mxu0 (!%p257_p3), %v781_v1  ;;  %681 = vmatprep.mubr.msk.bf16.mxu1 (!%p257_p3), %vm782_vm0, %v781_v1  ;;  %v735_v11 = vld [vmem:[%s930_s3 + $0x30] sm:$0xff] (!%p257_p3)   ;;  %v736_v12 = vld [vmem:[%s930_s3 + $0x38] sm:$0xff] (!%p257_p3)   ;;  %v628_v13 = vld [vmem:[%s929_s2] ss:$0 sm:$0xff] (!%p257_p3) }
   0xd   : > { %666 = vmatpush3.bf16.msra.mxu1 (!%p257_p3), %v729_v5  ;;  %v632_v29 = vld [vmem:[%s931_s4] ss:$0 sm:$0xff] (!%p257_p3) }
   0xe   : > { %667 = vmatprep.subr.bf16.mxu1 (!%p257_p3), %v781_v1  ;;  %v641_v46 = vld [vmem:[%s932_s5] ss:$0 sm:$0xff] (!%p257_p3) }
   0xf   : > { %660 = vmatpush3.bf16.msra.mxu0 (!%p257_p3), %v728_v2  ;;  %v642_v48 = vld [vmem:[%s933_s6] ss:$0 sm:$0xff] (!%p257_p3) }
  0x10   : > { %s946_s25 = smov (!%p294_p5, %s767_s25), 1  ;;  %s948_s24 = smov (!%p296_p6, %s763_s24), 1 }
  0x11   : > { %s624_s12 = sshll.u32 %s946_s25, 1  ;;  %668 = vmatpush3.bf16.msra.mxu1 %v730_v6 }
  0x12   : > { %s859_s13 = sadd.s32 %s624_s12, %s948_s24  ;;  %669 = vmatprep.subr.bf16.mxu1 %v781_v1 }
  0x13   : > { %s625_s14 = sshll.u32 %s859_s13, 3 }
  0x14   : > { %s301_s17 = scalar_lea.vmem %s927_s0, %s625_s14  ;;  %s309_s10 = scalar_lea.vmem %s934_s7, %s625_s14 }
  0x15   : > { %v311_v3 = vld [vmem:[%s301_s17] sm:$0xff]  ;;  %670 = vmatpush3.bf16.msra.mxu1 %v731_v7 }
  0x16   : > { %v312_v4 = vpack.c.bf16 %v311_v3, %v311_v3  ;;  %671 = vmatprep.subr.bf16.mxu1 %v781_v1 }
  0x18   : > { %662 = vmatmul.mubr.msk.bf16.vlgmr.msra.gmra.mrb[0].mxu0 %vm336_vm1, %v312_v4 }
  0x19   : > { %672 = vmatpush3.bf16.msra.mxu1 %v732_v8 }
  0x1a   : > { %673 = vmatprep.subr.bf16.mxu1 %v781_v1 }
  0x1d   : > { %674 = vmatpush3.bf16.msra.mxu1 %v733_v9 }
  0x1e   : > { %675 = vmatprep.subr.bf16.mxu1 %v781_v1 }
  0x21   : > { %676 = vmatpush3.bf16.msra.mxu1 %v734_v10 }
  0x22   : > { %677 = vmatprep.subr.bf16.mxu1 %v781_v1 }
  0x25   : > { %678 = vmatpush3.bf16.msra.mxu1 %v735_v11 }
  0x26   : > { %679 = vmatprep.subr.bf16.mxu1 %v781_v1 }
  0x29   : > { %680 = vmatpush3.bf16.msra.mxu1 %v736_v12 }
  0xeb   : > { %v374_v14 = vpop.f32.mrb[0].mxu0 }
  0xec   : > { %v375_v15 = vadd.f32 %v628_v13, %v374_v14  ;;  %v663_v16 = vpop.f32.mrb[1].mxu0 }
  0xed   : > { %v377_v17 = vpop.f32.mrb[2].mxu0 }
  0xee   : > { %v380_v18 = vmul.f32 %v375_v15, %v375_v15  ;;  %v664_v19 = vpop.f32.mrb[3].mxu0 }
  0xf0   : > { %v381_v20 = vmul.f32 %v380_v18, %v375_v15 }
  0xf2   : > { %v382_v21 = vmul.f32 0.044715, %v381_v20 }
  0xf4   : > { %v383_v22 = vadd.f32 %v382_v21, %v375_v15 }
  0xf6   : > { %v384_v23 = vmul.f32 0.7978846, %v383_v22 }
  0xf8   : > { %737 = vtanh.f32 %v384_v23 }
 0x102   : > { %v738_v24 = vpop.eup %737 }
 0x103   : > { %v386_v25 = vadd.f32 1.0, %v738_v24 }
 0x105   : > { %v387_v26 = vmul.f32 0.5, %v386_v25 }
 0x107   : > { %v388_v27 = vmul.f32 %v387_v26, %v375_v15 }
 0x109   : > { %v389_v28 = vpack.c.bf16 %v388_v27, %v388_v27 }
 0x10b   : > { %682 = vmatmul.mubr.bf16.vlgmr.msra.gmra.mrb[0].mxu1 %v389_v28 }
 0x1de   : > { %v495_v30 = vpop.f32.mrb[0].mxu1 }
 0x1df   : > { %v496_v31 = vadd.f32 %v632_v29, %v495_v30  ;;  %v683_v32 = vpop.f32.mrb[1].mxu1 }
 0x1e0   : > { %v498_v33 = vpop.f32.mrb[2].mxu1 }
 0x1e1   : > { %v684_v34 = vpop.f32.mrb[3].mxu1  ;;  %v501_v35 = vadd.f32 %v496_v31, %v311_v3 }
 0x1e3   : > { %v502_v36 = vsel %vm336_vm1, %v501_v35, 0.0 }
 0x1e4   : > { %503 = vadd.xlane.f32.xlu0 %v502_v36 }
 0x271   : > { %v504_v37 = vpop.xlane.xlu0 %503 }
 0x272   : > { %v506_v38 = vmul.f32 0.03125, %v504_v37 }
 0x274   : > { %v507_v39 = vsub.f32 %v501_v35, %v506_v38 }
 0x276   : > { %v508_v40 = vmul.f32 %v507_v39, %v507_v39 }
 0x278   : > { %v509_v41 = vsel %vm336_vm1, %v508_v40, 0.0 }
 0x279   : > { %510 = vadd.xlane.f32.xlu0 %v509_v41 }
 0x306   : > { %v511_v42 = vpop.xlane.xlu0 %510 }
 0x307   : > { %v512_v43 = vmul.f32 0.03125, %v511_v42 }
 0x309   : > { %v513_v44 = vadd.f32 1e-12, %v512_v43 }
 0x30b   : > { %739 = vrsqrt.f32 %v513_v44 }
 0x315   : > { %v740_v45 = vpop.eup %739 }
 0x316   : > { %v515_v47 = vmul.f32 %v740_v45, %v507_v39 }
 0x318   : > { %v523_v49 = vmul.f32 %v641_v46, %v515_v47 }
 0x31a   : > { %v531_v50 = vadd.f32 %v642_v48, %v523_v49 }
 0x31c   : > { %532 = vst.msk [vmem:[%s309_s10] sm:$0xff] %vm336_vm1, %v531_v50 }
 0x31d PF: > { %s17_s28 = sadd.s32 1, %s779_s28   ;;  %s935_s24 = smov %s771_s26 }
 0x31e   : > { %p14_p7 = scmp.ge.s32.totalorder %s17_s28, 6   ;;  %s936_s25 = smov %s775_s27 }
 0x31f   : > { %s937_s26 = smov %s940_s29  ;;  %s938_s27 = smov %s944_s30 }
 0x320   :  { %16 = sbr.rel (!%p14_p7) target bundleno = 3 (0x3), region = 78 }

// kernel: msa_forward.6
= control target key start
LH: loop header
LB: loop body
LE: loop exit
PB: predicated region body
PF: predicated region fallthrough
CT: control target
= control target key end

     0   :  { %s1581_s17 = smov 0   ;;  %s1583_s18 = smov 0   ;;  %s1765_s0 = inlined_call_operand.vmem [shape: f32[2,16,32], index: 0, kind: input, shape index: {}, may-alias: {0,1}]   ;;  %s1766_s1 = inlined_call_operand.vmem [shape: f32[2,16,32], index: 1, kind: input, shape index: {}, may-alias: {0,1}]   ;;  %s1767_s2 = inlined_call_operand.vmem [shape: f32[2,1,16], index: 2, kind: input, shape index: {}]   ;;  %s1768_s3 = inlined_call_operand.vmem [shape: bf16[32,32], index: 3, kind: input, shape index: {}]   ;;  %s1769_s4 = inlined_call_operand.vmem [shape: f32[1,32], index: 4, kind: input, shape index: {}]   ;;  %s1770_s5 = inlined_call_operand.vmem [shape: bf16[32,64], index: 5, kind: input, shape index: {}]   ;;  %s1771_s6 = inlined_call_operand.vmem [shape: f32[1,64], index: 6, kind: input, shape index: {}]   ;;  %s1772_s7 = inlined_call_operand.vmem [shape: bf16[32,32], index: 7, kind: input, shape index: {}]   ;;  %s1773_s8 = inlined_call_operand.vmem [shape: f32[1,32], index: 8, kind: input, shape index: {}]   ;;  %s1774_s9 = inlined_call_operand.vmem [shape: f32[1,32], index: 9, kind: input, shape index: {}]   ;;  %s1775_s10 = inlined_call_operand.vmem [shape: f32[1,32], index: 10, kind: input, shape index: {}]   ;;  %s1776_s11 = inlined_call_operand.vmem [shape: f32[2,16,32], index: 11, kind: output, shape index: {}]  }
   0x1   :  { %s1585_s19 = smov 0   ;;  %s1587_s20 = smov 0  }
   0x2   :  { %s1589_s21 = smov 0  }
   0x3 LB: > { %s30_s22 = sadd.s32 1, %s1499_s19  ;;  %s33_s23 = sadd.s32 1, %s1503_s20  ;;  %s1507_s21 = sphi %s1589_s21, %s21_s21   ;;  %s1503_s20 = sphi %s1587_s20, %s1780_s20   ;;  %s1499_s19 = sphi %s1585_s19, %s1779_s19   ;;  %s1495_s18 = sphi %s1583_s18, %s1778_s18   ;;  %s1491_s17 = sphi %s1581_s17, %s1777_s17  }
   0x4   : > { %p31_p0 = scmp.ge.s32.totalorder %s30_s22, 2  ;;  %p1263_p1 = scmp.ge.s32.totalorder %s1507_s21, 1 }
   0x5   : > { %p374_p2 = scmp.lt.s32.totalorder %s1507_s21, 5 }
   0x6   : > { %s1782_s22 = smov (%p31_p0, %s30_s22), 0  ;;  %s1784_s23 = smov (!%p31_p0, %s33_s23), %s1503_s20 }
   0x7   : > { %p375_p3 = pnand %p1263_p1, %p374_p2  ;;  %p35_p4 = scmp.ge.s32.totalorder %s1784_s23, 2 }
   0x8   : > { %v1445_v0 = vld [vmem:[%s1770_s5] sm:$0xff] (!%p375_p3)   ;;  %v1509_v1 = vmov (!%p375_p3), 0.0   ;;  %v1446_v2 = vld [vmem:[%s1770_s5 + $0x8] sm:$0xff] (!%p375_p3)   ;;  %vm1510_vm0 = vmmov (!%p375_p3), 0   ;;  %p428_p5 = scmp.lt.s32.totalorder (!%p375_p3), %s1495_s18, 1  ;;  %p430_p6 = scmp.lt.s32.totalorder (!%p375_p3), %s1491_s17, 1 }
   0x9   : > { %s1786_s23 = smov (%p35_p4, %s1784_s23), 0  ;;  %378 = sbr.rel (%p375_p3) target bundleno = 1784 (0x6f8), region = 64 }
   0xa   : > { %1329 = vmatprep.subr.bf16.mxu1 (!%p375_p3), %v1509_v1  ;;  %1321 = vmatprep.subr.bf16.mxu0 (!%p375_p3), %v1509_v1  ;;  %v1447_v3 = vld [vmem:[%s1768_s3] sm:$0xff] (!%p375_p3)   ;;  %v1448_v4 = vld [vmem:[%s1768_s3 + $0x8] sm:$0xff] (!%p375_p3)   ;;  %vm480_vm1 = vcmask (!%p375_p3), 261120   ;;  %vm601_vm2 = vcmask (!%p375_p3), 64512   ;;  %s1511_s14 = smov (!%p375_p3), 112   ;;  %s1512_s15 = smov (!%p375_p3), 120  }
   0xb   : > { %1330 = vmatpush3.bf16.msra.mxu1 (!%p375_p3), %v1445_v0  ;;  %1333 = vmatprep.mubr.msk.bf16.mxu1 (!%p375_p3), %vm1510_vm0, %v1509_v1  ;;  %v1274_v10 = vld [vmem:[%s1771_s6] ss:$0 sm:$0xff] (!%p375_p3)  ;;  %vm648_vm3 = vcmask (!%p375_p3), 130048   ;;  %s1517_s30 = smov (!%p375_p3), 88   ;;  %s1518_s12 = smov (!%p375_p3), 8   ;;  %vm822_vm4 = vcmask (!%p375_p3), 130112  }
   0xc   : > { %1331 = vmatprep.subr.bf16.mxu1 (!%p375_p3), %v1509_v1  ;;  %1325 = vmatprep.mubr.msk.bf16.mxu0 (!%p375_p3), %vm1510_vm0, %v1509_v1  ;;  %v1270_v17 = vld [vmem:[%s1769_s4] ss:$0 sm:$0xff] (!%p375_p3)  ;;  %s1520_s27 = smov (!%p375_p3), 24   ;;  %vm936_vm5 = vcmask (!%p375_p3), 195712   ;;  %vm1050_vm6 = vcmask (!%p375_p3), 261312  }
   0xd   : > { %1322 = vmatpush3.bf16.msra.mxu0 (!%p375_p3), %v1447_v3 }
   0xe   : > { %1323 = vmatprep.subr.bf16.mxu0 (!%p375_p3), %v1509_v1 }
   0xf   : > { %1332 = vmatpush3.bf16.msra.mxu1 (!%p375_p3), %v1446_v2 }
  0x10   : > { %s1788_s18 = smov (!%p428_p5, %s1495_s18), 1  ;;  %1343 = vmatprep.subr.bf16.mxu1 %v1509_v1  ;;  %s1790_s17 = smov (!%p430_p6, %s1491_s17), 1 }
  0x11   : > { %s1295_s13 = sshll.u32 %s1788_s18, 4  ;;  %s1264_s24 = sshll.u32 %s1788_s18, 1  ;;  %1324 = vmatpush3.bf16.msra.mxu0 %v1448_v4 }
  0x12   : > { %s440_s16 = scalar_lea.vmem %s1766_s1, %s1295_s13  ;;  %1337 = vmatprep.subr.bf16.mxu0 %v1509_v1  ;;  %s1644_s25 = sadd.s32 %s1264_s24, %s1790_s17 }
  0x13   : > { %v454_v5 = vld [vmem:[%s440_s16] sm:$0xff]  ;;  %v455_v6 = vld [vmem:[%s440_s16 + $0x8] sm:$0xff]  ;;  %s1265_s26 = sshll.u32 %s1644_s25, 3  ;;  %s1513_s16 = smov 104  }
  0x14   : > { %v524_v7 = vpack.c.bf16 %v455_v6, %v454_v5  ;;  %s435_s29 = scalar_lea.vmem %s1765_s0, %s1265_s26  ;;  %s443_s28 = scalar_lea.vmem %s1767_s2, %s1788_s18 }
  0x15   : > { %v1655_v8 = vld [vmem:[%s435_s29] sm:$0xff]  ;;  %s1514_s18 = smov 96   ;;  %s1515_s29 = smov 80  }
  0x16   : > { %1334 = vmatmul.mubr.msk.bf16.vlgmr.msra.gmra.mrb[0].mxu1 %vm480_vm1, %v524_v7  ;;  %v456_v9 = vpack.c.bf16 %v1655_v8, %v1655_v8  ;;  %v1278_v35 = vld [vmem:[%s443_s28] ss:$0 sm:$0xff]  ;;  %s1516_s17 = smov 72   ;;  %s1519_s24 = smov 16  }
  0x17   : > { %1345 = vmatprep.mubr.msk.bf16.mxu1 %vm1510_vm0, %v1509_v1 }
  0x18   : > { %1326 = vmatmul.mubr.msk.bf16.vlgmr.msra.gmra.mrb[0].mxu0 %vm480_vm1, %v456_v9 }
  0x19   : > { %1339 = vmatprep.mubr.msk.bf16.mxu0 %vm1510_vm0, %v1509_v1 }
  0xe9   : > { %v585_v11 = vpop.f32.mrb[0].mxu1 }
  0xea   : > { %v1335_v12 = vpop.f32.mrb[1].mxu1  ;;  %v586_v14 = vadd.f32 %v1274_v10, %v585_v11 }
  0xeb   : > { %v588_v13 = vpop.f32.mrb[2].mxu1  ;;  %v518_v19 = vpop.f32.mrb[0].mxu0 }
  0xec   : > { %v589_v15 = vadd.f32 %v1274_v10, %v588_v13  ;;  %v1336_v16 = vpop.f32.mrb[3].mxu1  ;;  %v519_v20 = vadd.f32 %v1270_v17, %v518_v19  ;;  %v1327_v21 = vpop.f32.mrb[1].mxu0 }
  0xed   : > { %v521_v23 = vpop.f32.mrb[2].mxu0 }
  0xee   : > { %v1668_v18 = vpack.c.bf16 %v589_v15, %v586_v14  ;;  %v592_v24 = vpack.c.bf16 %v519_v20, %v519_v20  ;;  %v1328_v25 = vpop.f32.mrb[3].mxu0 }
  0xf0   : > { %826 = vrot.lane.b32.xlu1 %v1668_v18, %s1511_s14  ;;  %712 = vrot.lane.b32.xlu0 %v1668_v18, %s1512_s15  ;;  %v606_v22 = vsel %vm601_vm2, %v1668_v18, 0 }
  0xf1   : > { %1338 = vmatpush3.bf16.xpose.msra.mxu0 %v606_v22 }
  0xf2   : > { %1349 = vmatprep.subr.bf16.mxu0 %v1509_v1 }
  0xf4   : > { %824 = vrot.lane.b32.xlu1 %v592_v24, %s1511_s14  ;;  %710 = vrot.lane.b32.xlu0 %v592_v24, %s1512_s15  ;;  %s451_s15 = scalar_lea.vmem %s1776_s11, %s1265_s26 }
  0xf8   : > { %938 = vrot.lane.b32.xlu1 %v592_v24, %s1513_s16  ;;  %940 = vrot.lane.b32.xlu0 %v1668_v18, %s1513_s16 }
  0xf9   : > { %1340 = vmatmul.mubr.msk.bf16.vlgmr.msra.gmra.mrb[4].mxu0 %vm601_vm2, %v592_v24 }
  0xfa   : > { %1351 = vmatprep.mubr.msk.bf16.mxu0 %vm1510_vm0, %v1509_v1 }
 0x162   : > { %v713_v26 = vpop.permute.xlu0 %712  ;;  %v827_v28 = vpop.permute.xlu1 %826 }
 0x163   : > { %v718_v27 = vsel %vm601_vm2, %v713_v26, 0  ;;  %v832_v30 = vsel %vm601_vm2, %v827_v28, 0 }
 0x164   : > { %1350 = vmatpush3.bf16.xpose.msra.mxu0 %v718_v27 }
 0x165   : > { %1361 = vmatprep.subr.bf16.mxu0 %v1509_v1 }
 0x166   : > { %v711_v29 = vpop.permute.xlu0 %710  ;;  %v825_v32 = vpop.permute.xlu1 %824 }
 0x16a   : > { %v941_v31 = vpop.permute.xlu0 %940  ;;  %v939_v34 = vpop.permute.xlu1 %938 }
 0x16b   : > { %1352 = vmatmul.mubr.msk.bf16.vlgmr.msra.gmra.mrb[8].mxu0 %vm601_vm2, %v711_v29  ;;  %v946_v33 = vsel %vm601_vm2, %v941_v31, 0 }
 0x16c   : > { %1362 = vmatpush3.bf16.xpose.msra.mxu0 %v832_v30  ;;  %1363 = vmatprep.mubr.msk.bf16.mxu0 %vm1510_vm0, %v1509_v1 }
 0x16d   : > { %1373 = vmatprep.subr.bf16.mxu0 %v1509_v1 }
 0x173   : > { %1364 = vmatmul.mubr.msk.bf16.vlgmr.msra.gmra.mrb[12].mxu0 %vm601_vm2, %v825_v32 }
 0x174   : > { %1374 = vmatpush3.bf16.xpose.msra.mxu0 %v946_v33  ;;  %1375 = vmatprep.mubr.msk.bf16.mxu0 %vm1510_vm0, %v1509_v1 }
 0x175   : > { %1385 = vmatprep.subr.bf16.mxu0 %v1509_v1 }
 0x17b   : > { %1376 = vmatmul.mubr.msk.bf16.vlgmr.msra.gmra.mrb[16].mxu0 %vm601_vm2, %v939_v34 }
 0x17c   : > { %1389 = vmatprep.mubr.msk.bf16.mxu0 %vm1510_vm0, %v1509_v1 }
 0x1cc   : > { %v642_v36 = vpop.f32.mrb[4].mxu0 }
 0x1cd   : > { %v643_v37 = vadd.f32 %v1278_v35, %v642_v36  ;;  %v1341_v38 = vpop.f32.mrb[5].mxu0 }
 0x1ce   : > { %v645_v39 = vpop.f32.mrb[6].mxu0 }
 0x1cf   : > { %v1342_v40 = vpop.f32.mrb[7].mxu0  ;;  %v649_v41 = vsel %vm648_vm3, %v643_v37, -inf }
 0x1d0   : > { %650 = vmax.xlane.f32.xlu0 %v649_v41 }
 0x23e   : > { %v754_v42 = vpop.f32.mrb[8].mxu0 }
 0x23f   : > { %v755_v43 = vadd.f32 %v1278_v35, %v754_v42  ;;  %v1353_v44 = vpop.f32.mrb[9].mxu0 }
 0x240   : > { %v757_v45 = vpop.f32.mrb[10].mxu0 }
 0x241   : > { %v1354_v46 = vpop.f32.mrb[11].mxu0  ;;  %v760_v47 = vsel %vm648_vm3, %v755_v43, -inf }
 0x242   : > { %761 = vmax.xlane.f32.xlu1 %v760_v47  ;;  %v1449_v46 = vld [vmem:[%s1772_s7] sm:$0xff]   ;;  %v1450_v47 = vld [vmem:[%s1772_s7 + $0x8] sm:$0xff]  }
 0x243   : > { %1386 = vmatpush3.bf16.msra.mxu0 %v1449_v46 }
 0x244   : > { %1387 = vmatprep.subr.bf16.mxu0 %v1509_v1 }
 0x246   : > { %v868_v48 = vpop.f32.mrb[12].mxu0 }
 0x247   : > { %v869_v49 = vadd.f32 %v1278_v35, %v868_v48  ;;  %v1365_v50 = vpop.f32.mrb[13].mxu0  ;;  %1388 = vmatpush3.bf16.msra.mxu0 %v1450_v47 }
 0x248   : > { %v871_v51 = vpop.f32.mrb[14].mxu0 }
 0x249   : > { %v1366_v52 = vpop.f32.mrb[15].mxu0  ;;  %v874_v53 = vsel %vm648_vm3, %v869_v49, -inf }
 0x24a   : > { %875 = vmax.xlane.f32.xlu0 %v874_v53 }
 0x24e   : > { %v982_v54 = vpop.f32.mrb[16].mxu0 }
 0x24f   : > { %v983_v55 = vadd.f32 %v1278_v35, %v982_v54  ;;  %v1377_v56 = vpop.f32.mrb[17].mxu0 }
 0x250   : > { %v985_v57 = vpop.f32.mrb[18].mxu0 }
 0x251   : > { %v1378_v58 = vpop.f32.mrb[19].mxu0  ;;  %v988_v59 = vsel %vm648_vm3, %v983_v55, -inf }
 0x252   : > { %989 = vmax.xlane.f32.xlu0 %v988_v59 }
 0x25d   : > { %v651_v60 = vpop.xlane.xlu0 %650 }
 0x25e   : > { %v652_v61 = vsub.f32 %v643_v37, %v651_v60  ;;  %v1287_v60 = vld [vmem:[%s1773_s8] ss:$0 sm:$0xff] }
 0x260   : > { %v653_v62 = vmul.f32 1.442695, %v652_v61 }
 0x262   : > { %1451 = vpow2.f32 %v653_v62 }
 0x26c   : > { %v1452_v63 = vpop.eup %1451 }
 0x26d   : > { %v655_v0 = vsel %vm648_vm3, %v1452_v63, 0.0 }
 0x26e   : > { %656 = vadd.xlane.f32.xlu1 %v655_v0 }
 0x27f   : > { %662 = vrot.lane.b32.xlu1 %v1668_v18, %s1514_s18 }
 0x2cf   : > { %v762_v2 = vpop.xlane.xlu1 %761 }
 0x2d0   : > { %v763_v3 = vsub.f32 %v755_v43, %v762_v2 }
 0x2d2   : > { %v764_v4 = vmul.f32 1.442695, %v763_v3 }
 0x2d4   : > { %1453 = vpow2.f32 %v764_v4 }
 0x2d7   : > { %v876_v5 = vpop.xlane.xlu0 %875 }
 0x2d8   : > { %v877_v6 = vsub.f32 %v869_v49, %v876_v5 }
 0x2da   : > { %v878_v7 = vmul.f32 1.442695, %v877_v6 }
 0x2dc   : > { %1455 = vpow2.f32 %v878_v7 }
 0x2de   : > { %v1454_v9 = vpop.eup %1453 }
 0x2df   : > { %v990_v10 = vpop.xlane.xlu0 %989  ;;  %v766_v11 = vsel %vm648_vm3, %v1454_v9, 0.0 }
 0x2e0   : > { %v991_v12 = vsub.f32 %v983_v55, %v990_v10  ;;  %767 = vadd.xlane.f32.xlu0 %v766_v11 }
 0x2e2   : > { %v992_v13 = vmul.f32 1.442695, %v991_v12 }
 0x2e4   : > { %1457 = vpow2.f32 %v992_v13 }
 0x2e6   : > { %v1456_v14 = vpop.eup %1455 }
 0x2e7   : > { %v880_v15 = vsel %vm648_vm3, %v1456_v14, 0.0 }
 0x2e8   : > { %881 = vadd.xlane.f32.xlu1 %v880_v15 }
 0x2ee   : > { %v1458_v16 = vpop.eup %1457 }
 0x2ef   : > { %v994_v17 = vsel %vm648_vm3, %v1458_v16, 0.0 }
 0x2f0   : > { %995 = vadd.xlane.f32.xlu0 %v994_v17 }
 0x2f9   : > { %886 = vrot.lane.b32.xlu1 %v1668_v18, %s1515_s29 }
 0x2fb   : > { %v657_v19 = vpop.xlane.xlu1 %656 }
 0x2fc   : > { %1459 = vrcp.f32 %v657_v19 }
 0x2fd   : > { %1000 = vrot.lane.b32.xlu1 %v1668_v18, %s1516_s17 }
 0x2ff   : > { %v663_v20 = vpop.permute.xlu1 %662 }
 0x300   : > { %1344 = vmatpush3.bf16.msra.mxu1 %v663_v20 }
 0x301   : > { %1355 = vmatprep.subr.bf16.mxu1 %v1509_v1 }
 0x306   : > { %v1460_v21 = vpop.eup %1459  ;;  %772 = vrot.lane.b32.xlu0 %v1668_v18, %s1517_s30 }
 0x307   : > { %v659_v22 = vmul.f32 %v1460_v21, %v1452_v63 }
 0x309   : > { %v660_v23 = vpack.c.bf16 %v659_v22, %v659_v22 }
 0x30b   : > { %1346 = vmatmul.mubr.msk.bf16.vlgmr.msra.gmra.mrb[4].mxu1 %vm648_vm3, %v660_v23 }
 0x30c   : > { %1357 = vmatprep.mubr.msk.bf16.mxu1 %vm1510_vm0, %v1509_v1 }
 0x36d   : > { %v768_v24 = vpop.xlane.xlu0 %767 }
 0x36e   : > { %1461 = vrcp.f32 %v768_v24 }
 0x375   : > { %v882_v25 = vpop.xlane.xlu1 %881 }
 0x376   : > { %1463 = vrcp.f32 %v882_v25 }
 0x378   : > { %v1462_v26 = vpop.eup %1461 }
 0x379   : > { %v770_v28 = vmul.f32 %v1462_v26, %v1454_v9  ;;  %v887_v31 = vpop.permute.xlu1 %886 }
 0x37b   : > { %v771_v30 = vpack.c.bf16 %v770_v28, %v770_v28 }
 0x37d   : > { %v996_v27 = vpop.xlane.xlu0 %995  ;;  %v1001_v35 = vpop.permute.xlu1 %1000 }
 0x37e   : > { %1465 = vrcp.f32 %v996_v27 }
 0x380   : > { %v1464_v18 = vpop.eup %1463 }
 0x381   : > { %v773_v29 = vpop.permute.xlu0 %772  ;;  %v884_v32 = vmul.f32 %v1464_v18, %v1456_v14 }
 0x382   : > { %1356 = vmatpush3.bf16.msra.mxu1 %v773_v29 }
 0x383   : > { %1367 = vmatprep.subr.bf16.mxu1 %v1509_v1  ;;  %v885_v33 = vpack.c.bf16 %v884_v32, %v884_v32 }
 0x385   : > { %1358 = vmatmul.mubr.msk.bf16.vlgmr.msra.gmra.mrb[8].mxu1 %vm648_vm3, %v771_v30 }
 0x386   : > { %1368 = vmatpush3.bf16.msra.mxu1 %v887_v31  ;;  %1369 = vmatprep.mubr.msk.bf16.mxu1 %vm1510_vm0, %v1509_v1 }
 0x387   : > { %1379 = vmatprep.subr.bf16.mxu1 %v1509_v1 }
 0x388   : > { %v1466_v34 = vpop.eup %1465 }
 0x389   : > { %v998_v36 = vmul.f32 %v1466_v34, %v1458_v16  ;;  %v1292_v16 = vld [vmem:[%s1775_s10] ss:$0 sm:$0xff] }
 0x38b   : > { %v999_v37 = vpack.c.bf16 %v998_v36, %v998_v36 }
 0x38d   : > { %1370 = vmatmul.mubr.msk.bf16.vlgmr.msra.gmra.mrb[12].mxu1 %vm648_vm3, %v885_v33 }
 0x38e   : > { %1380 = vmatpush3.bf16.msra.mxu1 %v1001_v35  ;;  %1381 = vmatprep.mubr.msk.bf16.mxu1 %vm1510_vm0, %v1509_v1 }
 0x395   : > { %1382 = vmatmul.mubr.msk.bf16.vlgmr.msra.gmra.mrb[16].mxu1 %vm648_vm3, %v999_v37 }
 0x3de   : > { %v702_v38 = vpop.f32.mrb[4].mxu1 }
 0x3df   : > { %708 = vst.msk [vmem:[#allocation2] sm:$0xff] %vm601_vm2, %v702_v38  ;;  %v1347_v39 = vpop.f32.mrb[5].mxu1 }
 0x3e0   : > { %v705_v40 = vpop.f32.mrb[6].mxu1 }
 0x3e1   : > { %v1348_v41 = vpop.f32.mrb[7].mxu1 }
 0x458   : > { %v812_v42 = vpop.f32.mrb[8].mxu1 }
 0x459   : > { %819 = vrot.lane.b32.xlu0 %v812_v42, %s1518_s12  ;;  %v1359_v43 = vpop.f32.mrb[9].mxu1 }
 0x45a   : > { %v815_v44 = vpop.f32.mrb[10].mxu1 }
 0x45b   : > { %v1360_v45 = vpop.f32.mrb[11].mxu1 }
 0x460   : > { %v926_v48 = vpop.f32.mrb[12].mxu1 }
 0x461   : > { %933 = vrot.lane.b32.xlu1 %v926_v48, %s1519_s24  ;;  %v1371_v49 = vpop.f32.mrb[13].mxu1 }
 0x462   : > { %v929_v50 = vpop.f32.mrb[14].mxu1 }
 0x463   : > { %v1372_v51 = vpop.f32.mrb[15].mxu1 }
 0x468   : > { %v1040_v52 = vpop.f32.mrb[16].mxu1 }
 0x469   : > { %1047 = vrot.lane.b32.xlu0 %v1040_v52, %s1520_s27  ;;  %v1383_v53 = vpop.f32.mrb[17].mxu1 }
 0x46a   : > { %v1043_v54 = vpop.f32.mrb[18].mxu1 }
 0x46b   : > { %v1384_v55 = vpop.f32.mrb[19].mxu1 }
 0x4cb   : > { %v820_v56 = vpop.permute.xlu0 %819 }
 0x4cc   : > { %823 = vst.msk [vmem:[#allocation2] sm:$0xff] %vm822_vm4, %v820_v56 }
 0x4d3   : > { %v934_v57 = vpop.permute.xlu1 %933 }
 0x4d4   : > { %937 = vst.msk [vmem:[#allocation2] sm:$0xff] %vm936_vm5, %v934_v57 }
 0x4db   : > { %v1048_v1 = vpop.permute.xlu0 %1047 }
 0x4dc   : > { %1051 = vst.msk [vmem:[#allocation2] sm:$0xff] %vm1050_vm6, %v1048_v1 }
 0x4e3   : > { %v1052_v58 = vld [vmem:[#allocation2] sm:$0xff] }
 0x4e4   : > { %v1053_v59 = vpack.c.bf16 %v1052_v58, %v1052_v58 }
 0x4e6   : > { %1390 = vmatmul.mubr.msk.bf16.vlgmr.msra.gmra.mrb[20].mxu0 %vm480_vm1, %v1053_v59 }
 0x5b9   : > { %v1114_v61 = vpop.f32.mrb[20].mxu0 }
 0x5ba   : > { %v1115_v62 = vadd.f32 %v1287_v60, %v1114_v61  ;;  %v1391_v63 = vpop.f32.mrb[21].mxu0 }
 0x5bb   : > { %v1117_v0 = vpop.f32.mrb[22].mxu0 }
 0x5bc   : > { %v1392_v2 = vpop.f32.mrb[23].mxu0  ;;  %v1120_v3 = vadd.f32 %v1115_v62, %v1655_v8  ;;  %v1291_v8 = vld [vmem:[%s1774_s9] ss:$0 sm:$0xff] }
 0x5be   : > { %v1121_v4 = vsel %vm480_vm1, %v1120_v3, 0.0 }
 0x5bf   : > { %1122 = vadd.xlane.f32.xlu1 %v1121_v4 }
 0x64c   : > { %v1123_v5 = vpop.xlane.xlu1 %1122 }
 0x64d   : > { %v1125_v6 = vmul.f32 0.03125, %v1123_v5 }
 0x64f   : > { %v1126_v7 = vsub.f32 %v1120_v3, %v1125_v6 }
 0x651   : > { %v1127_v9 = vmul.f32 %v1126_v7, %v1126_v7 }
 0x653   : > { %v1128_v10 = vsel %vm480_vm1, %v1127_v9, 0.0 }
 0x654   : > { %1129 = vadd.xlane.f32.xlu0 %v1128_v10 }
 0x6e1   : > { %v1130_v11 = vpop.xlane.xlu0 %1129 }
 0x6e2   : > { %v1131_v12 = vmul.f32 0.03125, %v1130_v11 }
 0x6e4   : > { %v1132_v13 = vadd.f32 1e-12, %v1131_v12 }
 0x6e6   : > { %1467 = vrsqrt.f32 %v1132_v13 }
 0x6f0   : > { %v1468_v14 = vpop.eup %1467 }
 0x6f1   : > { %v1134_v15 = vmul.f32 %v1468_v14, %v1126_v7 }
 0x6f3   : > { %v1142_v17 = vmul.f32 %v1291_v8, %v1134_v15 }
 0x6f5   : > { %v1150_v19 = vadd.f32 %v1292_v16, %v1142_v17 }
 0x6f7   : > { %1151 = vst.msk [vmem:[%s451_s15] sm:$0xff] %vm480_vm1, %v1150_v19 }
 0x6f8 PF: > { %s21_s21 = sadd.s32 1, %s1507_s21   ;;  %s1777_s17 = smov %s1499_s19 }
 0x6f9   : > { %p18_p7 = scmp.ge.s32.totalorder %s21_s21, 6   ;;  %s1778_s18 = smov %s1503_s20 }
 0x6fa   : > { %s1779_s19 = smov %s1782_s22  ;;  %s1780_s20 = smov %s1786_s23 }
 0x6fb   :  { %20 = sbr.rel (!%p18_p7) target bundleno = 3 (0x3), region = 100 }

// kernel: msa_forward.11
= control target key start
LH: loop header
LB: loop body
LE: loop exit
PB: predicated region body
PF: predicated region fallthrough
CT: control target
= control target key end

     0   :  { %vm75_vm0 = vcmask 261120   ;;  %vm25_vm1 = vcmask 7168   ;;  %v330_v4 = vmov -1e+30   ;;  %v131_v5 = vlaneseq  ;;  %s599_s1 = inlined_call_operand.vmem [shape: bf16[32,128], index: 1, kind: input, shape index: {}]   ;;  %s600_s0 = inlined_call_operand.vmem [shape: bf16[32,32], index: 0, kind: input, shape index: {}]   ;;  %s601_s4 = inlined_call_operand.vmem [shape: f32[32,1], index: 4, kind: output, shape index: {0}]   ;;  %s602_s2 = inlined_call_operand.vmem [shape: f32[1,128], index: 2, kind: input, shape index: {}]   ;;  %s603_s5 = inlined_call_operand.vmem [shape: f32[32,1], index: 5, kind: output, shape index: {1}]   ;;  %s604_s3 = inlined_call_operand.vmem [shape: s32[32,1], index: 3, kind: input, shape index: {}]   ;;  %s605_s6 = inlined_call_operand.vmem [shape: f32[32,1], index: 6, kind: output, shape index: {2}]  }
   0x1   :  { %v310_v0 = vld [vmem:[%s599_s1] sm:$0xff]   ;;  %v311_v1 = vld [vmem:[%s599_s1 + $0x8] sm:$0xff]   ;;  %28 = vst.msk [vmem:[%s601_s4 + $0x10] sm:$0xff] %vm25_vm1, %v330_v4  ;;  %26 = vst.msk [vmem:[%s601_s4] sm:$0xff] %vm25_vm1, %v330_v4  ;;  %v331_v20 = vmov 0   ;;  %v332_v21 = vmov 0.0  }
   0x2   :  { %297 = vmatprep.subr.bf16.mxu0 %v310_v0  ;;  %v312_v2 = vld [vmem:[%s600_s0] sm:$0xff]   ;;  %v313_v3 = vld [vmem:[%s600_s0 + $0x8] sm:$0xff]   ;;  %27 = vst.msk [vmem:[%s601_s4 + $0x8] sm:$0xff] %vm25_vm1, %v330_v4  ;;  %29 = vst.msk [vmem:[%s601_s4 + $0x18] sm:$0xff] %vm25_vm1, %v330_v4  ;;  %v396_v6 = vand.u32 127, %v131_v5  ;;  %309 = vset.pattern.permute.xlu1 %v331_v20 }
   0x3   :  { %298 = vmatpush3.bf16.msra.mxu0 %v310_v0  ;;  %301 = vmatprep.mubr.msk.bf16.mxu0 %vm75_vm0, %v312_v2  ;;  %v286_v7 = vld [vmem:[%s602_s2] ss:$0 sm:$0xff]  ;;  %32 = vst.msk [vmem:[%s603_s5 + $0x10] sm:$0xff] %vm25_vm1, %v332_v21  ;;  %30 = vst.msk [vmem:[%s603_s5] sm:$0xff] %vm25_vm1, %v332_v21  ;;  %v235_v39 = vld [vmem:[%s604_s3 + $0x8] sm:$0xff] }
   0x4   :  { %299 = vmatprep.subr.bf16.mxu0 %v311_v1  ;;  %vm136_vm2 = vcmp.lt.s32.totalorder %v396_v6, 64  ;;  %308 = vset.pattern.permute.xlu0 %v331_v20  ;;  %31 = vst.msk [vmem:[%s603_s5 + $0x8] sm:$0xff] %vm25_vm1, %v332_v21  ;;  %33 = vst.msk [vmem:[%s603_s5 + $0x18] sm:$0xff] %vm25_vm1, %v332_v21  ;;  %v234_v38 = vld [vmem:[%s604_s3] sm:$0xff]  ;;  %v236_v40 = vld [vmem:[%s604_s3 + $0x10] sm:$0xff] }
   0x5   :  { %v237_v41 = vld [vmem:[%s604_s3 + $0x18] sm:$0xff]  ;;  %34 = vst.msk [vmem:[%s605_s6] sm:$0xff] %vm25_vm1, %v332_v21  ;;  %35 = vst.msk [vmem:[%s605_s6 + $0x8] sm:$0xff] %vm25_vm1, %v332_v21 }
   0x6   :  { %36 = vst.msk [vmem:[%s605_s6 + $0x10] sm:$0xff] %vm25_vm1, %v332_v21  ;;  %37 = vst.msk [vmem:[%s605_s6 + $0x18] sm:$0xff] %vm25_vm1, %v332_v21 }
   0x7   :  { %300 = vmatpush3.bf16.msra.mxu0 %v311_v1 }
   0x8   :  { %v436_v22 = vld [vmem:[%s601_s4 + $0x10] sm:$0xff]  ;;  %v441_v23 = vld [vmem:[%s601_s4] sm:$0xff] }
   0x9   :  { %v452_v28 = vld [vmem:[%s601_s4 + $0x18] sm:$0xff]  ;;  %v465_v30 = vld [vmem:[%s601_s4 + $0x8] sm:$0xff] }
   0xa   :  { %302 = vmatmul.mubr.msk.bf16.vlgmr.msra.gmra.mrb[0].mxu0 %vm75_vm0, %v313_v3 }
   0xb   :  { %v158_v20 = vld [vmem:[%s603_s5 + $0x8] sm:$0xff] }
  0xdd   :  { %v303_v8 = vpop.f32.mrb[0].mxu0 }
  0xde   :  { %v402_v9 = vadd.f32 %v303_v8, %v286_v7  ;;  %v116_v10 = vpop.f32.mrb[1].mxu0 }
  0xdf   :  { %v404_v11 = vadd.f32 %v286_v7, %v116_v10  ;;  %v304_v12 = vpop.f32.mrb[2].mxu0 }
  0xe0   :  { %v406_v13 = vadd.f32 %v304_v12, %v286_v7  ;;  %v119_v14 = vpop.f32.mrb[3].mxu0  ;;  %v139_v15 = vsel %vm136_vm2, %v402_v9, -1e+30 }
  0xe1   :  { %v409_v16 = vadd.f32 %v286_v7, %v119_v14  ;;  %149 = vmax.xlane.f32.xlu1 %v139_v15  ;;  %v137_v17 = vsel %vm136_vm2, %v404_v11, -1e+30 }
  0xe2   :  { %145 = vmax.xlane.f32.xlu0 %v137_v17  ;;  %v413_v18 = vsel %vm136_vm2, %v406_v13, -1e+30 }
  0xe3   :  { %v138_v19 = vsel %vm136_vm2, %v409_v16, -1e+30 }
  0xe5   :  { %151 = vmax.xlane.f32.xlu1 %v413_v18 }
  0xe6   :  { %147 = vmax.xlane.f32.xlu0 %v138_v19 }
 0x16e   :  { %v150_v24 = vpop.xlane.xlu1 %149 }
 0x16f   :  { %v444_v25 = vmax.f32 %v436_v22, %v150_v24  ;;  %v146_v26 = vpop.xlane.xlu0 %145 }
 0x170   :  { %v447_v27 = vmax.f32 %v441_v23, %v146_v26 }
 0x171   :  { %v163_v29 = vsub.f32 %v436_v22, %v444_v25  ;;  %228 = vst.msk [vmem:[%s601_s4 + $0x10] sm:$0xff] %vm25_vm1, %v444_v25  ;;  %189 = vperm.xlu1 %309, %v444_v25   ;;  %v160_v25 = vld [vmem:[%s603_s5 + $0x18] sm:$0xff] }
 0x172   :  { %v161_v31 = vsub.f32 %v441_v23, %v447_v27  ;;  %226 = vst.msk [vmem:[%s601_s4] sm:$0xff] %vm25_vm1, %v447_v27  ;;  %v152_v32 = vpop.xlane.xlu1 %151  ;;  %179 = vperm.xlu0 %308, %v447_v27  }
 0x173   :  { %v476_v33 = vmax.f32 %v452_v28, %v152_v32  ;;  %v148_v34 = vpop.xlane.xlu0 %147  ;;  %v169_v2 = vmul.f32 1.442695, %v163_v29 }
 0x174   :  { %v479_v35 = vmax.f32 %v465_v30, %v148_v34  ;;  %v165_v3 = vmul.f32 1.442695, %v161_v31 }
 0x175   :  { %v164_v36 = vsub.f32 %v452_v28, %v476_v33  ;;  %229 = vst.msk [vmem:[%s601_s4 + $0x18] sm:$0xff] %vm25_vm1, %v476_v33  ;;  %194 = vperm.xlu1 %309, %v476_v33  }
 0x176   :  { %v162_v37 = vsub.f32 %v465_v30, %v479_v35  ;;  %227 = vst.msk [vmem:[%s601_s4 + $0x8] sm:$0xff] %vm25_vm1, %v479_v35  ;;  %v232_v30 = vld [vmem:[%s605_s6 + $0x10] sm:$0xff] }
 0x177   :  { %v171_v5 = vmul.f32 1.442695, %v164_v36 }
 0x178   :  { %v167_v4 = vmul.f32 1.442695, %v162_v37 }
 0x179   :  { %184 = vperm.xlu1 %309, %v479_v35   ;;  %v233_v35 = vld [vmem:[%s605_s6 + $0x18] sm:$0xff] }
 0x17d   :  { %239 = vperm.xlu1 %309, %v234_v38  }
 0x181   :  { %242 = vperm.xlu1 %309, %v235_v39  }
 0x185   :  { %245 = vperm.xlu1 %309, %v236_v40  }
 0x189   :  { %248 = vperm.xlu1 %309, %v237_v41  }
 0x1f0   :  { %v190_v42 = vpop.permute.xlu1 %189 }
 0x1f1   :  { %v199_v43 = vsub.f32 %v139_v15, %v190_v42  ;;  %v180_v44 = vpop.permute.xlu0 %179 }
 0x1f2   :  { %v197_v46 = vsub.f32 %v137_v17, %v180_v44 }
 0x1f3   :  { %v205_v45 = vmul.f32 1.442695, %v199_v43 }
 0x1f4   :  { %v195_v47 = vpop.permute.xlu1 %194  ;;  %v201_v48 = vmul.f32 1.442695, %v197_v46 }
 0x1f5   :  { %314 = vpow2.f32 %v205_v45  ;;  %v200_v49 = vsub.f32 %v413_v18, %v195_v47 }
 0x1f6   :  { %316 = vpow2.f32 %v201_v48 }
 0x1f7   :  { %v207_v53 = vmul.f32 1.442695, %v200_v49 }
 0x1f8   :  { %v185_v50 = vpop.permute.xlu1 %184 }
 0x1f9   :  { %v198_v51 = vsub.f32 %v138_v19, %v185_v50 }
 0x1fb   :  { %v203_v52 = vmul.f32 1.442695, %v198_v51 }
 0x1fc   :  { %v240_v54 = vpop.permute.xlu1 %239 }
 0x1fd   :  { %318 = vpow2.f32 %v203_v52  ;;  %vm250_vm3 = vcmp.eq.s32.totalorder %v396_v6, %v240_v54 }
 0x1fe   :  { %v254_v55 = vsel %vm250_vm3, %v404_v11, 0.0  ;;  %320 = vpow2.f32 %v207_v53  ;;  %v231_v11 = vld [vmem:[%s605_s6 + $0x8] sm:$0xff] }
 0x1ff   :  { %258 = vadd.xlane.f32.xlu0 %v254_v55  ;;  %v315_v57 = vpop.eup %314  ;;  %322 = vpow2.f32 %v169_v2 }
 0x200   :  { %v243_v56 = vpop.permute.xlu1 %242  ;;  %v317_v60 = vpop.eup %316  ;;  %324 = vpow2.f32 %v165_v3 }
 0x201   :  { %vm251_vm4 = vcmp.eq.s32.totalorder %v396_v6, %v243_v56  ;;  %326 = vpow2.f32 %v167_v4 }
 0x202   :  { %v255_v58 = vsel %vm251_vm4, %v409_v16, 0.0  ;;  %328 = vpow2.f32 %v171_v5  ;;  %v157_v16 = vld [vmem:[%s603_s5] sm:$0xff] }
 0x203   :  { %213 = vadd.xlane.f32.xlu0 %v315_v57  ;;  %260 = vadd.xlane.f32.xlu1 %v255_v58 }
 0x204   :  { %v246_v59 = vpop.permute.xlu1 %245 }
 0x205   :  { %vm252_vm5 = vcmp.eq.s32.totalorder %v396_v6, %v246_v59 }
 0x206   :  { %v256_v0 = vsel %vm252_vm5, %v402_v9, 0.0  ;;  %v159_v9 = vld [vmem:[%s603_s5 + $0x10] sm:$0xff] }
 0x207   :  { %v319_v61 = vpop.eup %318  ;;  %209 = vadd.xlane.f32.xlu1 %v317_v60 }
 0x208   :  { %211 = vadd.xlane.f32.xlu0 %v319_v61  ;;  %v249_v62 = vpop.permute.xlu1 %248  ;;  %v321_v63 = vpop.eup %320 }
 0x209   :  { %vm253_vm6 = vcmp.eq.s32.totalorder %v396_v6, %v249_v62  ;;  %v230_v6 = vld [vmem:[%s605_s6] sm:$0xff]  ;;  %v323_v7 = vpop.eup %322 }
 0x20a   :  { %v257_v1 = vsel %vm253_vm6, %v406_v13, 0.0  ;;  %v175_v12 = vmul.f32 %v323_v7, %v159_v9  ;;  %v325_v13 = vpop.eup %324 }
 0x20b   :  { %215 = vadd.xlane.f32.xlu1 %v321_v63  ;;  %v327_v17 = vpop.eup %326  ;;  %v173_v21 = vmul.f32 %v325_v13, %v157_v16 }
 0x20c   :  { %262 = vadd.xlane.f32.xlu0 %v256_v0  ;;  %v329_v22 = vpop.eup %328  ;;  %v174_v24 = vmul.f32 %v327_v17, %v158_v20 }
 0x20d   :  { %v176_v29 = vmul.f32 %v329_v22, %v160_v25 }
 0x20f   :  { %264 = vadd.xlane.f32.xlu1 %v257_v1 }
 0x28c   :  { %v259_v8 = vpop.xlane.xlu0 %258 }
 0x28d   :  { %v266_v10 = vadd.f32 %v259_v8, %v230_v6 }
 0x28f   :  { %270 = vst.msk [vmem:[%s605_s6] sm:$0xff] %vm25_vm1, %v266_v10 }
 0x290   :  { %v261_v14 = vpop.xlane.xlu1 %260  ;;  %v214_v15 = vpop.xlane.xlu0 %213 }
 0x291   :  { %v267_v18 = vadd.f32 %v261_v14, %v231_v11  ;;  %v219_v19 = vadd.f32 %v214_v15, %v175_v12 }
 0x293   :  { %271 = vst.msk [vmem:[%s605_s6 + $0x8] sm:$0xff] %vm25_vm1, %v267_v18  ;;  %224 = vst.msk [vmem:[%s603_s5 + $0x10] sm:$0xff] %vm25_vm1, %v219_v19 }
 0x294   :  { %v210_v23 = vpop.xlane.xlu1 %209 }
 0x295   :  { %v217_v26 = vadd.f32 %v210_v23, %v173_v21  ;;  %v212_v27 = vpop.xlane.xlu0 %211 }
 0x296   :  { %v218_v28 = vadd.f32 %v212_v27, %v174_v24 }
 0x297   :  { %222 = vst.msk [vmem:[%s603_s5] sm:$0xff] %vm25_vm1, %v217_v26 }
 0x298   :  { %223 = vst.msk [vmem:[%s603_s5 + $0x8] sm:$0xff] %vm25_vm1, %v218_v28  ;;  %v216_v31 = vpop.xlane.xlu1 %215 }
 0x299   :  { %v220_v32 = vadd.f32 %v216_v31, %v176_v29  ;;  %v263_v33 = vpop.xlane.xlu0 %262 }
 0x29a   :  { %v268_v34 = vadd.f32 %v263_v33, %v232_v30 }
 0x29b   :  { %225 = vst.msk [vmem:[%s603_s5 + $0x18] sm:$0xff] %vm25_vm1, %v220_v32 }
 0x29c   :  { %272 = vst.msk [vmem:[%s605_s6 + $0x10] sm:$0xff] %vm25_vm1, %v268_v34  ;;  %v265_v36 = vpop.xlane.xlu1 %264 }
 0x29d   :  { %v269_v37 = vadd.f32 %v265_v36, %v233_v35 }
 0x29f   :  { %273 = vst.msk [vmem:[%s605_s6 + $0x18] sm:$0xff] %vm25_vm1, %v269_v37 }

</bundles_post_ra>
